<compile_context>
chip_gen: v6e
topology: v6e:2x2x1
jax: 0.10.0
libtpu: 0.0.40
codegen_flags: <defaults>
</compile_context>

<pallas_src>
import numpy as np
import jax
import jax.numpy as jnp
from jax import lax
from jax.experimental import pallas as pl
from jax.experimental.pallas import tpu as pltpu

_LANE = 128


def _pos_enc_kernel(eidx_ref, nidx_ref, repf_ref, phase_ref, out_ref):
    # eidx_ref : (TN, K)      int32    neighbor indices for this row tile
    # nidx_ref : (TN, 1)      int32    node index of each row (row % N, precomputed)
    # repf_ref : (K, K*2F)    float32  block-diag repeat matrix with freq2 folded in
    # phase_ref: (1, K*2F)    float32  0 for cos lanes, pi/2 for sin lanes
    # out_ref  : (TN, K*2F)   f32/bf16 lane-dense output block
    d = (eidx_ref[...] - nidx_ref[...]).astype(jnp.float32)           # (TN, K)
    # One MXU matmul does the lane expansion AND the frequency scaling:
    #   angles[r, k*2F + j] = d[r, k] * freq2[j]
    # HIGHEST keeps the integer offsets exact (single-pass bf16 rounds |d| > 256).
    angles = jnp.dot(d, repf_ref[...],
                     precision=lax.Precision.HIGHEST,
                     preferred_element_type=jnp.float32)               # (TN, K*2F)
    angles = angles - phase_ref[...]                                   # cos(x - pi/2) == sin(x)
    out_ref[...] = jnp.cos(angles).astype(out_ref.dtype)


def _choose_tile_rows(total_rows, k, k2f, out_itemsize,
                      target_out_block_bytes=6 << 20,
                      vmem_budget_bytes=40 << 20):
    """Largest row tile such that the output block is ~6 MiB and the double-
    buffered VMEM footprint (with 128-lane padding of the int blocks) stays
    under ~40 MiB (safe even for v7x's 64 MiB physical VMEM)."""
    pad = lambda v: ((v + _LANE - 1) // _LANE) * _LANE
    # per-row VMEM bytes, double buffered: eidx (lane-padded) + node-idx (padded) + output
    per_row = 2 * (4 * pad(k) + 4 * pad(1) + out_itemsize * pad(k2f))
    cap_vmem = max(8, vmem_budget_bytes // per_row)
    cap_out = max(8, target_out_block_bytes // max(1, out_itemsize * k2f))
    cap = min(cap_vmem, cap_out)
    cap = max(8, cap - cap % 8)
    if total_rows <= cap:
        return total_rows
    # Prefer a divisor of total_rows (no ragged last tile) but only if it stays
    # large (>= cap/2); otherwise take the big ragged tile (masked writeback).
    for tn in range(cap, max(8, cap // 2) - 1, -8):
        if total_rows % tn == 0:
            return tn
    return cap


def positional_encodings(E_idx, num_embeddings, period_range=(2, 1000),
                         max_relative_feature=32, af2_relpos=False,
                         out_dtype=jnp.float32):
    """Pallas implementation of PositionalEncodings.forward (af2_relpos=False path)."""
    assert not af2_relpos, "af2_relpos path not implemented in this kernel"
    assert num_embeddings % 2 == 0, "num_embeddings must be even"
    del period_range, max_relative_feature  # only used by the (unimplemented) af2 path

    B, N, K = E_idx.shape
    F_half = num_embeddings // 2
    K2F = K * num_embeddings
    R = B * N

    # frequency = exp(arange(0, num_embeddings, 2) * -(log(10000)/num_embeddings))
    freq = np.exp(np.arange(0, num_embeddings, 2, dtype=np.float32)
                  * (-(np.log(10000.0) / num_embeddings))).astype(np.float32)       # (F,)
    freq2 = np.concatenate([freq, freq]).astype(np.float32)                          # (2F,) cos|sin lanes
    # rep_freq[k, k*2F + j] = freq2[j]  (block-diagonal repeat with freq folded in)
    rep_freq = np.kron(np.eye(K, dtype=np.float32), freq2[None, :]).astype(np.float32)  # (K, K*2F)
    phase_row = np.tile(np.concatenate([np.zeros(F_half, np.float32),
                                        np.full(F_half, np.pi / 2, np.float32)]),
                        K)[None, :].astype(np.float32)                               # (1, K*2F)

    out_itemsize = int(np.dtype(out_dtype).itemsize)
    TN = _choose_tile_rows(R, K, K2F, out_itemsize)
    grid = (pl.cdiv(R, TN),)

    pad = lambda v: ((v + _LANE - 1) // _LANE) * _LANE
    per_row = 2 * (4 * pad(K) + 4 * pad(1) + out_itemsize * pad(K2F))
    const_bytes = 2 * (4 * K * pad(K2F) + 4 * pad(K2F))
    vmem_limit = int(min(max(TN * per_row + const_bytes + (2 << 20), 32 << 20), 48 << 20))

    eidx_flat = E_idx.reshape(R, K).astype(jnp.int32)                                # free reshape
    node_idx = jnp.tile(jnp.arange(N, dtype=jnp.int32), B).reshape(R, 1)             # row % N

    out_flat = pl.pallas_call(
        _pos_enc_kernel,
        out_shape=jax.ShapeDtypeStruct((R, K2F), out_dtype),
        grid_spec=pltpu.PrefetchScalarGridSpec(
            num_scalar_prefetch=0,
            grid=grid,
            in_specs=[
                pl.BlockSpec((TN, K), lambda r: (r, 0)),
                pl.BlockSpec((TN, 1), lambda r: (r, 0)),
                pl.BlockSpec((K, K2F), lambda r: (0, 0)),     # constant index -> fetched once
                pl.BlockSpec((1, K2F), lambda r: (0, 0)),     # constant index -> fetched once
            ],
            out_specs=pl.BlockSpec((TN, K2F), lambda r: (r, 0)),
        ),
        compiler_params=pltpu.CompilerParams(
            dimension_semantics=("parallel",),
            vmem_limit_bytes=vmem_limit),
    )(eidx_flat, node_idx, jnp.asarray(rep_freq), jnp.asarray(phase_row))

    # (R, K*2F) -> (B, N, K, 2F): contiguous reshape == torch.cat((cos, sin), -1)
    return out_flat.reshape(B, N, K, num_embeddings)


def _reference(E_idx, num_embeddings):
    # pure-JAX reference mirroring the PyTorch code
    N = E_idx.shape[1]
    ii = jnp.arange(N, dtype=jnp.float32).reshape(1, -1, 1)
    d = (E_idx.astype(jnp.float32) - ii)[..., None]
    freq = jnp.exp(jnp.arange(0, num_embeddings, 2, dtype=jnp.float32)
                   * (-(np.log(10000.0) / num_embeddings)))
    angles = d * freq.reshape(1, 1, 1, -1)
    return jnp.concatenate([jnp.cos(angles), jnp.sin(angles)], axis=-1)


if __name__ == "__main__":
    key = jax.random.PRNGKey(0)
    B, N, K = 2, 16, 8
    num_embeddings = 32
    # neighbor indices into the node axis
    E_idx = jax.random.randint(key, (B, N, K), minval=0, maxval=N, dtype=jnp.int32)

    ref = _reference(E_idx, num_embeddings)

    # f32 output (exact match to the PyTorch reference semantics)
    out = positional_encodings(E_idx, num_embeddings)
    out = jax.block_until_ready(out)
    assert out.shape == (B, N, K, num_embeddings)
    np.testing.assert_allclose(np.asarray(out), np.asarray(ref), rtol=1e-5, atol=3e-5)

    # bf16 output variant (halves HBM writeback; all math stays f32 in-kernel)
    out_bf16 = positional_encodings(E_idx, num_embeddings, out_dtype=jnp.bfloat16)
    out_bf16 = jax.block_until_ready(out_bf16)
    np.testing.assert_allclose(np.asarray(out_bf16.astype(jnp.float32)),
                               np.asarray(ref), atol=1e-2)

    print("KERNEL_OK")
</pallas_src>

<mosaic_0001>
module attributes {stable_mosaic.version = 11 : i64} {
  func.func @_pos_enc_kernel(%arg0: i32, %arg1: memref<32x8xi32, #tpu.memory_space<vmem>>, %arg2: memref<32x1xi32, #tpu.memory_space<vmem>>, %arg3: memref<8x256xf32, #tpu.memory_space<vmem>>, %arg4: memref<1x256xf32, #tpu.memory_space<vmem>>, %arg5: memref<32x256xf32, #tpu.memory_space<vmem>>) attributes {dimension_semantics = [#tpu.dimension_semantics<parallel>], iteration_bounds = array<i64: 1>, scalar_prefetch = 0 : i64, scratch_operands = 0 : i64, tpu.core_type = #tpu.core_type<tc>, window_params = [{transform_indices = @transform_0, window_bounds = array<i64: 32, 8>}, {transform_indices = @transform_1, window_bounds = array<i64: 32, 1>}, {pipeline_mode = #tpu.pipeline_mode<synchronous>, transform_indices = @transform_2, window_bounds = array<i64: 8, 256>}, {pipeline_mode = #tpu.pipeline_mode<synchronous>, transform_indices = @transform_3, window_bounds = array<i64: 1, 256>}, {transform_indices = @transform_4, window_bounds = array<i64: 32, 256>}]} {
    %c0 = arith.constant 0 : index
    %c0_0 = arith.constant 0 : index
    %0 = vector.load %arg1[%c0, %c0_0] : memref<32x8xi32, #tpu.memory_space<vmem>>, vector<32x8xi32>
    %c0_1 = arith.constant 0 : index
    %c0_2 = arith.constant 0 : index
    %1 = vector.load %arg2[%c0_1, %c0_2] : memref<32x1xi32, #tpu.memory_space<vmem>>, vector<32x1xi32>
    %2 = vector.broadcast %1 : vector<32x1xi32> to vector<32x8xi32>
    %3 = arith.subi %0, %2 : vector<32x8xi32>
    %4 = arith.sitofp %3 : vector<32x8xi32> to vector<32x8xf32>
    %c0_3 = arith.constant 0 : index
    %c0_4 = arith.constant 0 : index
    %5 = vector.load %arg3[%c0_3, %c0_4] : memref<8x256xf32, #tpu.memory_space<vmem>>, vector<8x256xf32>
    %cst = arith.constant dense<0.000000e+00> : vector<32x256xf32>
    %6 = tpu.matmul %4, %5, %cst {dimension_numbers = #tpu.dot_dimension_numbers<[1], [0], [0], [1], [0, 0, 1, 1], [], []>, precision = #tpu.contract_precision<fp32>} : vector<32x8xf32>, vector<8x256xf32>, vector<32x256xf32> -> vector<32x256xf32>
    %c0_5 = arith.constant 0 : index
    %c0_6 = arith.constant 0 : index
    %7 = vector.load %arg4[%c0_5, %c0_6] : memref<1x256xf32, #tpu.memory_space<vmem>>, vector<1x256xf32>
    %8 = vector.broadcast %7 : vector<1x256xf32> to vector<32x256xf32>
    %9 = arith.subf %6, %8 : vector<32x256xf32>
    %10 = math.cos %9 : vector<32x256xf32>
    %c0_7 = arith.constant 0 : index
    %c0_8 = arith.constant 0 : index
    %11 = vector.load %arg5[%c0_7, %c0_8] : memref<32x256xf32, #tpu.memory_space<vmem>>, vector<32x256xf32>
    tpu.vector_store %arg5[%c0_7, %c0_8], %10 {strides = array<i32>} : memref<32x256xf32, #tpu.memory_space<vmem>>, vector<32x256xf32>,
    return
  }
  func.func @transform_0(%arg0: i32) -> (i32, i32) {
    %c0_i32 = arith.constant 0 : i32
    %c0_i32_0 = arith.constant 0 : i32
    return %arg0, %c0_i32 : i32, i32
  }
  func.func @transform_1(%arg0: i32) -> (i32, i32) {
    %c0_i32 = arith.constant 0 : i32
    %c0_i32_0 = arith.constant 0 : i32
    return %arg0, %c0_i32 : i32, i32
  }
  func.func @transform_2(%arg0: i32) -> (i32, i32) {
    %c0_i32 = arith.constant 0 : i32
    %c0_i32_0 = arith.constant 0 : i32
    %c0_i32_1 = arith.constant 0 : i32
    return %c0_i32, %c0_i32_0 : i32, i32
  }
  func.func @transform_3(%arg0: i32) -> (i32, i32) {
    %c0_i32 = arith.constant 0 : i32
    %c0_i32_0 = arith.constant 0 : i32
    %c0_i32_1 = arith.constant 0 : i32
    return %c0_i32, %c0_i32_0 : i32, i32
  }
  func.func @transform_4(%arg0: i32) -> (i32, i32) {
    %c0_i32 = arith.constant 0 : i32
    %c0_i32_0 = arith.constant 0 : i32
    return %arg0, %c0_i32 : i32, i32
  }
}

</mosaic_0001>

<bundles_post_ra>
// kernel: tpu_custom_call.1
= control target key start
LH: loop header
LB: loop body
LE: loop exit
PB: predicated region body
PF: predicated region fallthrough
CT: control target
= control target key end

     0   :  { %v1672_v2 = vmov 0   ;;  %s2408_s0 = inlined_call_operand.vmem [shape: s32[32,8], index: 0, kind: input, shape index: {}]   ;;  %s2409_s1 = inlined_call_operand.vmem [shape: s32[32,1], index: 1, kind: input, shape index: {}]   ;;  %s2410_s2 = inlined_call_operand.vmem [shape: f32[8,256], index: 2, kind: input, shape index: {}]   ;;  %s2411_s3 = inlined_call_operand.vmem [shape: f32[1,256], index: 3, kind: input, shape index: {}]   ;;  %s2412_s4 = inlined_call_operand.hbm [shape: f32[32,256], index: 4, kind: output, shape index: {}]  }
   0x1   :  { %v24_v0 = vld [vmem:[%s2409_s1 + $0x10] sm:$0xff]  ;;  %v22_v1 = vld [vmem:[%s2409_s1] sm:$0xff]  ;;  %1617 = vset.pattern.permute.xlu1 %v1672_v2  ;;  %1616 = vset.pattern.permute.xlu0 %v1672_v2  ;;  %v25_v3 = vld [vmem:[%s2409_s1 + $0x18] sm:$0xff] }
   0x2   :  { %33 = vperm.xlu1 %1617, %v24_v0   ;;  %27 = vperm.xlu0 %1616, %v22_v1   ;;  %v47_v4 = vld [vmem:[%s2410_s2 + $0x8] sm:$0xff]  ;;  %v46_v7 = vld [vmem:[%s2410_s2] sm:$0xff] }
   0x3   :  { %v23_v5 = vld [vmem:[%s2409_s1 + $0x8] sm:$0xff]  ;;  %v91_v6 = vand.u32 4294901760, %v47_v4 }
   0x4   :  { %9 = vsyncpa [#allocation3], 0  ;;  %v1726_v8 = vand.u32 4294901760, %v46_v7  ;;  %v1673_v9 = vmov 0.0   ;;  %v20_v18 = vld [vmem:[%s2408_s0 + $0x10] sm:$0xff]  ;;  %v18_v19 = vld [vmem:[%s2408_s0] sm:$0xff] }
   0x5   :  { %246 = vmatprep.mubr.f32.mxu1 %v1673_v9  ;;  %127 = vmatprep.mubr.f32.mxu0 %v1673_v9  ;;  %v1730_v10 = vsub.f32 %v47_v4, %v91_v6  ;;  %vm48_vm0 = vcmask 64512   ;;  %v21_v24 = vld [vmem:[%s2408_s0 + $0x18] sm:$0xff]  ;;  %v19_v25 = vld [vmem:[%s2408_s0 + $0x8] sm:$0xff] }
   0x6   :  { %92 = vmatprep.subr.mxu0 %v91_v6  ;;  %36 = vperm.xlu1 %1617, %v25_v3   ;;  %v1733_v11 = vsub.f32 %v46_v7, %v1726_v8 }
   0x7   :  { %30 = vperm.xlu0 %1616, %v23_v5   ;;  %v204_v12 = vand.u32 4294901760, %v1730_v10  ;;  %94 = vmatpush1.msra.mxu0 %v1726_v8 }
   0x8   :  { %v210_v13 = vand.u32 4294901760, %v1733_v11  ;;  %307 = vmatprep.subr.mxu0 %v1730_v10 }
   0x9   :  { %v205_v14 = vsub.f32 %v1730_v10, %v204_v12 }
   0xa   :  { %v211_v15 = vsub.f32 %v1733_v11, %v210_v13 }
   0xb   :  { %v206_v16 = vand.u32 4294901760, %v205_v14 }
   0xc   :  { %v212_v17 = vand.u32 4294901760, %v211_v15 }
   0xd   :  { %207 = vmatprep.subr.mxu1 %v206_v16 }
   0xe   :  { %213 = vmatpush1.msra.mxu1 %v212_v17 }
   0xf   :  { %407 = vmatprep.subr.mxu1 %v91_v6 }
  0x7d   :  { %v34_v20 = vpop.permute.xlu1 %33  ;;  %v28_v21 = vpop.permute.xlu0 %27 }
  0x7e   :  { %v40_v22 = vsub.s32 %v20_v18, %v34_v20  ;;  %v38_v23 = vsub.s32 %v18_v19, %v28_v21 }
  0x80   :  { %v44_v26 = vcvt.s32.f32 %v40_v22  ;;  %v42_v27 = vcvt.s32.f32 %v38_v23 }
  0x81   :  { %v37_v28 = vpop.permute.xlu1 %36 }
  0x82   :  { %v31_v29 = vpop.permute.xlu0 %30  ;;  %v56_v30 = vsel %vm48_vm0, %v44_v26, 0  ;;  %v50_v31 = vsel %vm48_vm0, %v42_v27, 0  ;;  %v41_v32 = vsub.s32 %v21_v24, %v37_v28  ;;  %v675_v24 = vlaneseq }
  0x83   :  { %v39_v33 = vsub.s32 %v19_v25, %v31_v29  ;;  %v1757_v34 = vand.u32 4294901760, %v56_v30  ;;  %v1759_v35 = vand.u32 4294901760, %v50_v31 }
  0x84   :  { %v45_v36 = vcvt.s32.f32 %v41_v32  ;;  %v676_v29 = vshrl.u32 %v675_v24, 7 }
  0x85   :  { %v43_v37 = vcvt.s32.f32 %v39_v33  ;;  %v129_v38 = vsub.f32 %v50_v31, %v1759_v35  ;;  %248 = vmatmul.mubr.f32.vlgmr.msra.gmra.mxu1 %v1759_v35  ;;  %v151_v41 = vsub.f32 %v56_v30, %v1757_v34 }
  0x86   :  { %v59_v39 = vsel %vm48_vm0, %v45_v36, 0  ;;  %253 = vmatprep.mubr.f32.mxu1 %v1673_v9  ;;  %409 = vmatpush1.msra.mxu1 %v1726_v8 }
  0x87   :  { %v53_v40 = vsel %vm48_vm0, %v43_v37, 0  ;;  %v1768_v42 = vand.u32 4294901760, %v59_v39  ;;  %v130_v44 = vand.u32 4294901760, %v129_v38  ;;  %609 = vmatprep.subr.mxu1 %v91_v6  ;;  %v152_v50 = vand.u32 4294901760, %v151_v41 }
  0x88   :  { %v139_v43 = vand.u32 4294901760, %v53_v40 }
  0x89   :  { %v131_v46 = vsub.f32 %v129_v38, %v130_v44  ;;  %v162_v47 = vsub.f32 %v59_v39, %v1768_v42  ;;  %v153_v53 = vsub.f32 %v151_v41, %v152_v50 }
  0x8a   :  { %v140_v45 = vsub.f32 %v53_v40, %v139_v43  ;;  %255 = vmatmul.mubr.f32.gmra.mxu1 %v139_v43  ;;  %v677_v40 = vsub.s32 0, %v676_v29 }
  0x8b   :  { %260 = vmatprep.mubr.f32.mxu1 %v1673_v9  ;;  %v132_v48 = vand.u32 4294901760, %v131_v46  ;;  %v163_v54 = vand.u32 4294901760, %v162_v47  ;;  %v154_v55 = vand.u32 4294901760, %v153_v53  ;;  %v673_v46 = vld [vmem:[%s2411_s3] sm:$0x3]  ;;  %v681_v53 = vsub.s32 1, %v676_v29 }
  0x8c   :  { %v141_v49 = vand.u32 4294901760, %v140_v45  ;;  %s1680_s3 = smov [#allocation2]  }
  0x8d   :  { %133 = vmatmul.mubr.f32.vlgmr.msra.gmra.mxu0 %v132_v48  ;;  %v164_v56 = vsub.f32 %v162_v47, %v163_v54  ;;  %s1530_s8 = sshll.u32 %s1680_s3, 4  ;;  %s1531_s8 = int_to_ptr.vmem [resolvable:$true] %s1530_s8 }
  0x8e   :  { %262 = vmatmul.mubr.f32.gmra.mxu1 %v1757_v34  ;;  %v142_v51 = vsub.f32 %v140_v45, %v141_v49  ;;  %310 = vmatpush1.msra.mxu0 %v1733_v11  ;;  %s1650_s9 = scalar_lea.vmem %s1531_s8, 1024  ;;  %p1655_p1 = scmp.lt.s32.totalorder %s1531_s8, %s1531_s8 }
  0x8f   :  { %138 = vmatprep.mubr.f32.mxu0 %v1673_v9  ;;  %267 = vmatprep.mubr.f32.mxu1 %v1673_v9  ;;  %v165_v57 = vand.u32 4294901760, %v164_v56  ;;  %p1651_p0 = scmp.ne.s32.totalorder %s1531_s8, %s1650_s9  ;;  %p1656_p2 = scmp.lt.s32.totalorder %s1650_s9, %s1650_s9 }
  0x90   :  { %v143_v52 = vand.u32 4294901760, %v142_v51  ;;  %512 = vmatprep.subr.mxu0 %v204_v12 }
  0x91   :  { %p1657_p3 = por %p1656_p2, %p1655_p1 }
  0x92   :  { %144 = vmatmul.mubr.f32.gmra.mxu0 %v143_v52  ;;  %269 = vmatmul.mubr.f32.gmra.mxu1 %v1768_v42 }
  0x93   :  { %149 = vmatprep.mubr.f32.mxu0 %v1673_v9  ;;  %442 = vmatprep.mubr.f32.mxu1 %v1673_v9  ;;  %p1658_p4 = pnand %p1657_p3, %p1651_p0 }
  0x96   :  { %155 = vmatmul.mubr.f32.gmra.mxu0 %v154_v55  ;;  %446 = vmatmul.mubr.f32.vlgmr.msra.gmra.mxu1 %v130_v44  ;;  %v1813_v55 = vrot.slane %v673_v46, %v677_v40  ;;  %v1676_v40 = vmov 2131351028  }
  0x97   :  { %160 = vmatprep.mubr.f32.mxu0 %v1673_v9  ;;  %451 = vmatprep.mubr.f32.mxu1 %v1673_v9 }
  0x98   :  { %611 = vmatpush1.msra.mxu1 %v1726_v8 }
  0x9a   :  { %166 = vmatmul.mubr.f32.gmra.mxu0 %v165_v57  ;;  %455 = vmatmul.mubr.f32.gmra.mxu1 %v141_v49 }
  0x9b   :  { %343 = vmatprep.mubr.f32.mxu0 %v1673_v9  ;;  %460 = vmatprep.mubr.f32.mxu1 %v1673_v9 }
  0x9e   :  { %346 = vmatmul.mubr.f32.vlgmr.msra.gmra.mxu0 %v129_v38  ;;  %464 = vmatmul.mubr.f32.gmra.mxu1 %v152_v50 }
  0x9f   :  { %516 = vmatpush1.msra.mxu0 %v210_v13  ;;  %351 = vmatprep.mubr.f32.mxu0 %v1673_v9 }
  0xa0   :  { %469 = vmatprep.mubr.f32.mxu1 %v1673_v9 }
  0xa2   :  { %354 = vmatmul.mubr.f32.gmra.mxu0 %v140_v45  ;;  %473 = vmatmul.mubr.f32.gmra.mxu1 %v163_v54 }
  0xa3   :  { %359 = vmatprep.mubr.f32.mxu0 %v1673_v9  ;;  %644 = vmatprep.mubr.f32.mxu1 %v1673_v9 }
  0xa6   :  { %362 = vmatmul.mubr.f32.gmra.mxu0 %v151_v41  ;;  %646 = vmatmul.mubr.f32.vlgmr.msra.gmra.mxu1 %v1759_v35 }
  0xa7   :  { %367 = vmatprep.mubr.f32.mxu0 %v1673_v9  ;;  %651 = vmatprep.mubr.f32.mxu1 %v1673_v9 }
  0xaa   :  { %370 = vmatmul.mubr.f32.gmra.mxu0 %v162_v47  ;;  %653 = vmatmul.mubr.f32.gmra.mxu1 %v139_v43 }
  0xab   :  { %549 = vmatprep.mubr.f32.mxu0 %v1673_v9  ;;  %658 = vmatprep.mubr.f32.mxu1 %v1673_v9 }
  0xae   :  { %551 = vmatmul.mubr.f32.vlgmr.msra.gmra.mxu0 %v1759_v35  ;;  %660 = vmatmul.mubr.f32.gmra.mxu1 %v1757_v34 }
  0xaf   :  { %556 = vmatprep.mubr.f32.mxu0 %v1673_v9  ;;  %665 = vmatprep.mubr.f32.mxu1 %v1673_v9 }
  0xb2   :  { %558 = vmatmul.mubr.f32.gmra.mxu0 %v139_v43  ;;  %667 = vmatmul.mubr.f32.gmra.mxu1 %v1768_v42 }
  0xb3   :  { %563 = vmatprep.mubr.f32.mxu0 %v1673_v9 }
  0xb6   :  { %565 = vmatmul.mubr.f32.gmra.mxu0 %v1757_v34 }
  0xb7   :  { %570 = vmatprep.mubr.f32.mxu0 %v1673_v9 }
  0xba   :  { %572 = vmatmul.mubr.f32.gmra.mxu0 %v1768_v42 }
 0x145   :  { %v249_v58 = vpop.f32.mrf.mxu1 }
 0x147   :  { %v251_v59 = vpop.f32.mrf.mxu1 }
 0x14a   :  { %v256_v60 = vpop.f32.mrf.mxu1 }
 0x14c   :  { %v258_v61 = vpop.f32.mrf.mxu1 }
 0x14d   :  { %v134_v62 = vpop.f32.mrf.mxu0 }
 0x14e   :  { %v263_v63 = vpop.f32.mrf.mxu1  ;;  %v250_v30 = vadd.f32 %v249_v58, %v134_v62 }
 0x14f   :  { %v136_v0 = vpop.f32.mrf.mxu0 }
 0x150   :  { %v265_v1 = vpop.f32.mrf.mxu1  ;;  %v252_v34 = vadd.f32 %v251_v59, %v136_v0 }
 0x152   :  { %v145_v2 = vpop.f32.mrf.mxu0  ;;  %v270_v3 = vpop.f32.mrf.mxu1 }
 0x153   :  { %v257_v41 = vadd.f32 %v256_v60, %v145_v2 }
 0x154   :  { %v147_v4 = vpop.f32.mrf.mxu0  ;;  %v272_v5 = vpop.f32.mrf.mxu1 }
 0x155   :  { %v259_v6 = vadd.f32 %v258_v61, %v147_v4 }
 0x156   :  { %v156_v7 = vpop.f32.mrf.mxu0  ;;  %v447_v8 = vpop.f32.mrf.mxu1 }
 0x157   :  { %v264_v10 = vadd.f32 %v263_v63, %v156_v7  ;;  %v1817_v63 = vrot.slane %v673_v46, %v681_v53  ;;  %v1679_v53 = vmov 1326507024  }
 0x158   :  { %v158_v11 = vpop.f32.mrf.mxu0  ;;  %v449_v9 = vpop.f32.mrf.mxu1 }
 0x159   :  { %v266_v12 = vadd.f32 %v265_v1, %v158_v11 }
 0x15a   :  { %v167_v13 = vpop.f32.mrf.mxu0  ;;  %v456_v14 = vpop.f32.mrf.mxu1 }
 0x15b   :  { %v271_v15 = vadd.f32 %v270_v3, %v167_v13 }
 0x15c   :  { %v169_v16 = vpop.f32.mrf.mxu0  ;;  %v458_v17 = vpop.f32.mrf.mxu1 }
 0x15d   :  { %v273_v18 = vadd.f32 %v272_v5, %v169_v16 }
 0x15e   :  { %v347_v19 = vpop.f32.mrf.mxu0  ;;  %v465_v20 = vpop.f32.mrf.mxu1 }
 0x15f   :  { %v348_v35 = vadd.f32 %v347_v19, %v250_v30 }
 0x160   :  { %v349_v21 = vpop.f32.mrf.mxu0  ;;  %v467_v22 = vpop.f32.mrf.mxu1 }
 0x161   :  { %v350_v42 = vadd.f32 %v349_v21, %v252_v34  ;;  %v448_v50 = vadd.f32 %v447_v8, %v348_v35  ;;  %v1674_v35 = vmov 683565275  }
 0x162   :  { %v355_v23 = vpop.f32.mrf.mxu0  ;;  %v474_v26 = vpop.f32.mrf.mxu1 }
 0x163   :  { %v356_v47 = vadd.f32 %v355_v23, %v257_v41  ;;  %v450_v56 = vadd.f32 %v449_v9, %v350_v42  ;;  %v1677_v42 = vmov 2102212464  }
 0x164   :  { %v357_v25 = vpop.f32.mrf.mxu0  ;;  %v476_v36 = vpop.f32.mrf.mxu1 }
 0x165   :  { %v358_v27 = vadd.f32 %v357_v25, %v259_v6  ;;  %v457_v62 = vadd.f32 %v456_v14, %v356_v47 }
 0x166   :  { %v363_v28 = vpop.f32.mrf.mxu0  ;;  %v647_v48 = vpop.f32.mrf.mxu1 }
 0x167   :  { %v364_v31 = vadd.f32 %v363_v28, %v264_v10  ;;  %v459_v32 = vadd.f32 %v458_v17, %v358_v27 }
 0x168   :  { %v365_v33 = vpop.f32.mrf.mxu0  ;;  %v649_v59 = vpop.f32.mrf.mxu1 }
 0x169   :  { %v366_v37 = vadd.f32 %v365_v33, %v266_v12  ;;  %v1804_v38 = vadd.f32 %v465_v20, %v364_v31 }
 0x16a   :  { %v371_v39 = vpop.f32.mrf.mxu0  ;;  %v654_v4 = vpop.f32.mrf.mxu1 }
 0x16b   :  { %v372_v43 = vadd.f32 %v371_v39, %v271_v15  ;;  %v1806_v44 = vadd.f32 %v467_v22, %v366_v37  ;;  %v1675_v37 = vmov 2475754826  }
 0x16c   :  { %v373_v45 = vpop.f32.mrf.mxu0  ;;  %v656_v24 = vpop.f32.mrf.mxu1 }
 0x16d   :  { %v374_v49 = vadd.f32 %v373_v45, %v273_v18  ;;  %v1811_v51 = vadd.f32 %v474_v26, %v372_v43  ;;  %v1678_v45 = vmov 920167782  }
 0x16e   :  { %v552_v52 = vpop.f32.mrf.mxu0 }
 0x16f   :  { %v553_v54 = vadd.f32 %v552_v52, %v448_v50  ;;  %v1815_v57 = vadd.f32 %v476_v36, %v374_v49 }
 0x170   :  { %v554_v58 = vpop.f32.mrf.mxu0 }
 0x171   :  { %v648_v60 = vadd.f32 %v647_v48, %v553_v54  ;;  %v555_v61 = vadd.f32 %v554_v58, %v450_v56 }
 0x172   :  { %v559_v0 = vpop.f32.mrf.mxu0 }
 0x173   :  { %v1820_v1 = vsub.f32 %v648_v60, %v1813_v55  ;;  %v650_v2 = vadd.f32 %v649_v59, %v555_v61  ;;  %v560_v3 = vadd.f32 %v559_v0, %v457_v62 }
 0x174   :  { %v561_v13 = vpop.f32.mrf.mxu0 }
 0x175   :  { %v693_v5 = vand.u32 2147483647, %v1820_v1  ;;  %v696_v6 = vand.u32 2139095040, %v1820_v1  ;;  %v1825_v7 = vsub.f32 %v650_v2, %v1817_v63  ;;  %v655_v8 = vadd.f32 %v654_v4, %v560_v3 }
 0x176   :  { %v562_v19 = vadd.f32 %v561_v13, %v459_v32  ;;  %vm695_vm15 = vcmp.lt.s32.totalorder %v1820_v1, 0 }
 0x177   :  { %v697_v10 = vshrl.u32 %v696_v6, 23  ;;  %v700_v11 = vand.u32 8388607, %v693_v5  ;;  %v796_v9 = vand.u32 2147483647, %v1825_v7  ;;  %v799_v12 = vand.u32 2139095040, %v1825_v7 }
 0x178   :  { %v1832_v15 = vsub.f32 %v655_v8, %v1813_v55  ;;  %v1837_v29 = vadd.f32 %v656_v24, %v562_v19 }
 0x179   :  { %v1541_v14 = vadd.s32 4294967169, %v697_v10  ;;  %v800_v16 = vshrl.u32 %v799_v12, 23  ;;  %v803_v17 = vand.u32 8388607, %v796_v9  ;;  %v701_v20 = vor.u32 8388608, %v700_v11 }
 0x17a   :  { %v902_v23 = vand.u32 2139095040, %v1832_v15  ;;  %v899_v33 = vand.u32 2147483647, %v1832_v15 }
 0x17b   :  { %v703_v18 = vadd.s32 1, %v1541_v14  ;;  %v1545_v21 = vadd.s32 4294967169, %v800_v16  ;;  %v804_v22 = vor.u32 8388608, %v803_v17  ;;  %v1839_v30 = vshll.u32 %v701_v20, 8 }
 0x17c   :  { %v903_v32 = vshrl.u32 %v902_v23, 23 }
 0x17d   :  { %vm704_vm1 = vcmp.gt.s32.totalorder %v703_v18, 0  ;;  %v806_v26 = vadd.s32 1, %v1545_v21  ;;  %v1841_v31 = vshll.u32 %v804_v22, 8 }
 0x17e   :  { %v705_v25 = vsel %vm704_vm1, %v703_v18, 0  ;;  %v1549_v17 = vadd.s32 4294967169, %v903_v32 }
 0x17f   :  { %v706_v27 = vshrl.u32 %v705_v25, 5  ;;  %v707_v28 = vand.u32 31, %v705_v25  ;;  %vm807_vm2 = vcmp.gt.s32.totalorder %v806_v26, 0 }
 0x180   :  { %v808_v60 = vsel %vm807_vm2, %v806_v26, 0 }
 0x181   :  { %v708_v34 = vsub.s32 32, %v707_v28  ;;  %v710_v36 = vshll.u32 %v1674_v35, %v707_v28  ;;  %v713_v39 = vshll.u32 %v1675_v37, %v707_v28  ;;  %v716_v41 = vshll.u32 %v1676_v40, %v707_v28 }
 0x182   :  { %v719_v43 = vshll.u32 %v1677_v42, %v707_v28  ;;  %v722_v46 = vshll.u32 %v1678_v45, %v707_v28  ;;  %vm725_vm3 = vcmp.lt.s32.totalorder %v706_v27, 1  ;;  %vm726_vm4 = vcmp.lt.s32.totalorder %v706_v27, 2 }
 0x183   :  { %v711_v47 = vshrl.u32 %v1675_v37, %v708_v34  ;;  %v714_v48 = vshrl.u32 %v1676_v40, %v708_v34  ;;  %v717_v49 = vshrl.u32 %v1677_v42, %v708_v34  ;;  %v709_v50 = vshrl.u32 %v1674_v35, %v708_v34 }
 0x184   :  { %v720_v52 = vshrl.u32 %v1678_v45, %v708_v34  ;;  %v723_v54 = vshrl.u32 %v1679_v53, %v708_v34  ;;  %vm727_vm5 = vcmp.lt.s32.totalorder %v706_v27, 3  ;;  %vm728_vm6 = vcmp.lt.s32.totalorder %v706_v27, 4 }
 0x185   :  { %v712_v56 = vor.u32 %v711_v47, %v710_v36  ;;  %v715_v58 = vor.u32 %v714_v48, %v713_v39  ;;  %v718_v59 = vor.u32 %v717_v49, %v716_v41  ;;  %v810_v0 = vand.u32 31, %v808_v60 }
 0x186   :  { %v721_v61 = vor.u32 %v720_v52, %v719_v43  ;;  %v724_v62 = vor.u32 %v723_v54, %v722_v46  ;;  %v809_v20 = vshrl.u32 %v808_v60, 5 }
 0x187   :  { %v729_v2 = vsel %vm725_vm3, %v709_v50, %v712_v56  ;;  %v730_v3 = vsel %vm728_vm6, %v718_v59, 2102212464  ;;  %v733_v4 = vsel %vm725_vm3, %v712_v56, %v715_v58  ;;  %v737_v6 = vsel %vm725_vm3, %v715_v58, %v718_v59 }
 0x188   :  { %v731_v8 = vsel %vm727_vm5, %v715_v58, %v730_v3  ;;  %v734_v10 = vsel %vm728_vm6, %v721_v61, 920167782  ;;  %v738_v11 = vsel %vm728_vm6, %v724_v62, 1326507024  ;;  %v811_v12 = vsub.s32 32, %v810_v0 }
 0x189   :  { %v732_v13 = vsel %vm726_vm4, %v729_v2, %v731_v8  ;;  %v735_v14 = vsel %vm727_vm5, %v718_v59, %v734_v10  ;;  %v739_v16 = vsel %vm727_vm5, %v721_v61, %v738_v11  ;;  %v813_v21 = vshll.u32 %v1674_v35, %v810_v0 }
 0x18a   :  { %v736_v18 = vsel %vm726_vm4, %v733_v4, %v735_v14  ;;  %v740_v19 = vsel %vm726_vm4, %v737_v6, %v739_v16  ;;  %v748_v26 = vmul.u32 %v1839_v30, %v732_v13  ;;  %v814_v28 = vshrl.u32 %v1675_v37, %v811_v12 }
 0x18b   :  { %v1867_v22 = vmul.u32.u64.low %v1839_v30, %v740_v19  ;;  %v1868_v23 = vmul.u32.u64.high %v1839_v30, %v740_v19, %v1867_v22  ;;  %v1871_v24 = vmul.u32.u64.low %v1839_v30, %v736_v18  ;;  %v1872_v25 = vmul.u32.u64.high %v1839_v30, %v736_v18, %v1871_v24 }
 0x18c   :  { %v816_v32 = vshll.u32 %v1675_v37, %v810_v0  ;;  %v817_v27 = vshrl.u32 %v1676_v40, %v811_v12  ;;  %v819_v34 = vshll.u32 %v1676_v40, %v810_v0  ;;  %v820_v36 = vshrl.u32 %v1677_v42, %v811_v12 }
 0x18d   :  { %v822_v39 = vshll.u32 %v1677_v42, %v810_v0  ;;  %v823_v41 = vshrl.u32 %v1678_v45, %v811_v12  ;;  %v815_v43 = vor.u32 %v814_v28, %v813_v21  ;;  %v825_v47 = vshll.u32 %v1678_v45, %v810_v0 }
 0x18e   :  { %v818_v46 = vor.u32 %v817_v27, %v816_v32  ;;  %v826_v30 = vshrl.u32 %v1679_v53, %v811_v12  ;;  %vm750_vm7 = vc.u32 %v1868_v23, %v1871_v24  ;;  %v751_v48 = vadd.s32 1, %v1872_v25 }
 0x18f   :  { %v812_v49 = vshrl.u32 %v1674_v35, %v811_v12  ;;  %v821_v50 = vor.u32 %v820_v36, %v819_v34  ;;  %v824_v52 = vor.u32 %v823_v41, %v822_v39  ;;  %vm828_vm8 = vcmp.lt.s32.totalorder %v809_v20, 1 }
 0x190   :  { %v827_v54 = vor.u32 %v826_v30, %v825_v47  ;;  %vm829_vm9 = vcmp.lt.s32.totalorder %v809_v20, 2  ;;  %v752_v56 = vsel %vm750_vm7, %v751_v48, %v1872_v25  ;;  %vm830_vm10 = vcmp.lt.s32.totalorder %v809_v20, 3 }
 0x191   :  { %vm831_vm11 = vcmp.lt.s32.totalorder %v809_v20, 4  ;;  %v836_v58 = vsel %vm828_vm8, %v815_v43, %v818_v46  ;;  %v753_v59 = vadd.s32 %v752_v56, %v748_v26  ;;  %v840_v62 = vsel %vm828_vm8, %v818_v46, %v821_v50  ;;  %v566_v20 = vpop.f32.mrf.mxu0 }
 0x192   :  { %v833_v60 = vsel %vm831_vm11, %v821_v50, 2102212464  ;;  %v837_v61 = vsel %vm831_vm11, %v824_v52, 920167782  ;;  %v832_v0 = vsel %vm828_vm8, %v812_v49, %v815_v43  ;;  %v841_v3 = vsel %vm831_vm11, %v827_v54, 1326507024 }
 0x193   :  { %v838_v2 = vsel %vm830_vm10, %v821_v50, %v837_v61  ;;  %v909_v4 = vadd.s32 1, %v1549_v17  ;;  %v754_v6 = vadd.s32 536870912, %v753_v59  ;;  %v834_v8 = vsel %vm830_vm10, %v818_v46, %v833_v60 }
 0x194   :  { %v839_v10 = vsel %vm829_vm9, %v836_v58, %v838_v2  ;;  %v842_v11 = vsel %vm830_vm10, %v824_v52, %v841_v3  ;;  %v906_v16 = vand.u32 8388607, %v899_v33  ;;  %v835_v21 = vsel %vm829_vm9, %v832_v0, %v834_v8 }
 0x195   :  { %v843_v12 = vsel %vm829_vm9, %v840_v62, %v842_v11  ;;  %v1893_v13 = vmul.u32.u64.low %v1841_v31, %v839_v10  ;;  %v1894_v14 = vmul.u32.u64.high %v1841_v31, %v839_v10, %v1893_v13  ;;  %v1899_v18 = vshrl.u32 %v754_v6, 30 }
 0x196   :  { %v1902_v19 = vmul.u32.u64.low %v1841_v31, %v843_v12  ;;  %v1903_v17 = vmul.u32.u64.high %v1841_v31, %v843_v12, %v1902_v19  ;;  %vm910_vm12 = vcmp.gt.s32.totalorder %v909_v4, 0  ;;  %v1908_v25 = vsub.f32 %v1837_v29, %v1817_v63 }
 0x197   :  { %v911_v22 = vsel %vm910_vm12, %v909_v4, 0  ;;  %v756_v26 = vshll.u32 %v1899_v18, 30  ;;  %v854_v32 = vadd.s32 1, %v1894_v14  ;;  %v851_v34 = vmul.u32 %v1841_v31, %v835_v21 }
 0x198   :  { %v913_v28 = vand.u32 31, %v911_v22  ;;  %vm853_vm13 = vc.u32 %v1903_v17, %v1893_v13  ;;  %v907_v36 = vor.u32 8388608, %v906_v16  ;;  %v1005_v29 = vand.u32 2139095040, %v1908_v25 }
 0x199   :  { %v1912_v27 = vsub.s32 %v753_v59, %v756_v26  ;;  %v855_v39 = vsel %vm853_vm13, %v854_v32, %v1894_v14  ;;  %v1921_v47 = vadd.f32 %v566_v20, %v1804_v38  ;;  %v749_v30 = vadd.s32 %v1871_v24, %v1868_v23 }
 0x19a   :  { %v914_v41 = vsub.s32 32, %v913_v28  ;;  %v856_v46 = vadd.s32 %v855_v39, %v851_v34  ;;  %v1926_v48 = vshll.u32 %v907_v36, 8  ;;  %v1002_v49 = vand.u32 2147483647, %v1908_v25 }
 0x19b   :  { %v759_v43 = vsub.s32 0, %v1912_v27  ;;  %v1006_v56 = vshrl.u32 %v1005_v29, 23  ;;  %v1931_v59 = vshrl.u32 %v911_v22, 5  ;;  %v916_v24 = vshll.u32 %v1674_v35, %v913_v28 }
 0x19c   :  { %v857_v50 = vadd.s32 536870912, %v856_v46  ;;  %v917_v52 = vshrl.u32 %v1675_v37, %v914_v41  ;;  %v920_v54 = vshrl.u32 %v1676_v40, %v914_v41  ;;  %v923_v38 = vshrl.u32 %v1677_v42, %v914_v41 }
 0x19d   :  { %v1542_v31 = vmin.u32 %v759_v43, %v1912_v27  ;;  %v926_v60 = vshrl.u32 %v1678_v45, %v914_v41  ;;  %v919_v61 = vshll.u32 %v1675_v37, %v913_v28  ;;  %v925_v62 = vshll.u32 %v1677_v42, %v913_v28 }
 0x19e   :  { %v1935_v23 = vshrl.u32 %v857_v50, 30  ;;  %v779_v2 = vsub.s32 4, %v1899_v18  ;;  %v922_v3 = vshll.u32 %v1676_v40, %v913_v28  ;;  %v929_v4 = vshrl.u32 %v1679_v53, %v914_v41 }
 0x19f   :  { %v761_v58 = vclz %v1542_v31  ;;  %v918_v8 = vor.u32 %v917_v52, %v916_v24  ;;  %v921_v10 = vor.u32 %v920_v54, %v919_v61  ;;  %v927_v11 = vor.u32 %v926_v60, %v925_v62 }
 0x1a0   :  { %v859_v6 = vshll.u32 %v1935_v23, 30  ;;  %v924_v12 = vor.u32 %v923_v38, %v922_v3  ;;  %v928_v14 = vshll.u32 %v1678_v45, %v913_v28  ;;  %v1553_v16 = vadd.s32 4294967169, %v1006_v56 }
 0x1a1   :  { %v1543_v0 = vadd.s32 4294967294, %v761_v58  ;;  %v915_v22 = vshrl.u32 %v1674_v35, %v914_v41  ;;  %vm931_vm0 = vcmp.lt.s32.totalorder %v1931_v59, 1  ;;  %vm934_vm1 = vcmp.lt.s32.totalorder %v1931_v59, 4 }
 0x1a2   :  { %v1946_v21 = vsub.s32 %v856_v46, %v859_v6  ;;  %v930_v34 = vor.u32 %v929_v4, %v928_v14  ;;  %vm933_vm2 = vcmp.lt.s32.totalorder %v1931_v59, 3  ;;  %v939_v28 = vsel %vm931_vm0, %v918_v8, %v921_v10 }
 0x1a3   :  { %vm1544_vm14 = vcmp.lt.s32.totalorder %v1543_v0, 0  ;;  %v940_v20 = vsel %vm934_vm1, %v927_v11, 920167782  ;;  %vm1959_vm3 = vcmp.le.f32.partialorder %v693_v5, 0.7853982  ;;  %vm798_vm4 = vcmp.lt.s32.totalorder %v1825_v7, 0 }
 0x1a4   :  { %v764_v19 = vsel %vm1544_vm14, 0, %v1543_v0  ;;  %v862_v36 = vsub.s32 0, %v1946_v21  ;;  %v941_v46 = vsel %vm933_vm2, %v924_v12, %v940_v20  ;;  %vm932_vm5 = vcmp.lt.s32.totalorder %v1931_v59, 2 }
 0x1a5   :  { %v765_v26 = vsub.s32 32, %v764_v19  ;;  %v769_v32 = vsub.s32 4294967266, %v764_v19  ;;  %v766_v41 = vshll.u32 %v1912_v27, %v764_v19  ;;  %v936_v50 = vsel %vm934_vm1, %v924_v12, 2102212464 }
 0x1a6   :  { %v1546_v31 = vmin.u32 %v862_v36, %v1946_v21  ;;  %v943_v5 = vsel %vm931_vm0, %v921_v10, %v924_v12  ;;  %v942_v27 = vsel %vm932_vm5, %v939_v28, %v941_v46  ;;  %vm1979_vm6 = vcmp.le.f32.partialorder %v796_v9, 0.7853982 }
 0x1a7   :  { %v767_v29 = vshrl.u32 %v749_v30, %v765_v26  ;;  %v770_v43 = vadd.s32 127, %v769_v32  ;;  %v944_v30 = vsel %vm934_vm1, %v930_v34, 1326507024  ;;  %v935_v62 = vsel %vm931_vm0, %v915_v22, %v918_v8 }
 0x1a8   :  { %v864_v58 = vclz %v1546_v31  ;;  %v945_v38 = vsel %vm933_vm2, %v927_v11, %v944_v30  ;;  %v1986_v60 = vmul.u32.u64.low %v1926_v48, %v942_v27  ;;  %v1987_v24 = vmul.u32.u64.high %v1926_v48, %v942_v27, %v1986_v60 }
 0x1a9   :  { %v768_v52 = vor.u32 %v767_v29, %v766_v41  ;;  %v771_v54 = vshll.u32 %v770_v43, 23  ;;  %v937_v0 = vsel %vm933_vm2, %v921_v10, %v936_v50  ;;  %v946_v9 = vsel %vm932_vm5, %v943_v5, %v945_v38  ;;  %v661_v5 = vpop.f32.mrf.mxu1 }
 0x1aa   :  { %v1547_v3 = vadd.s32 4294967294, %v864_v58  ;;  %v882_v4 = vsub.s32 4, %v1935_v23  ;;  %v1998_v6 = vmul.u32.u64.low %v1926_v48, %v946_v9  ;;  %v1999_v11 = vmul.u32.u64.high %v1926_v48, %v946_v9, %v1998_v6 }
 0x1ab   :  { %v772_v61 = vor.u32 4788187, %v771_v54  ;;  %v775_v14 = vcvt.s32.f32 %v768_v52  ;;  %v780_v19 = vsel %vm695_vm15, %v779_v2, %v1899_v18  ;;  %v1012_v8 = vadd.s32 1, %v1553_v16 }
 0x1ac   :  { %vm1548_vm7 = vcmp.lt.s32.totalorder %v1547_v3, 0  ;;  %v938_v10 = vsel %vm932_vm5, %v935_v62, %v937_v0  ;;  %v957_v22 = vadd.s32 1, %v1987_v24  ;;  %v2009_v26 = vand.u32 8388607, %v1002_v49 }
 0x1ad   :  { %v773_v12 = vand.u32 2147483647, %v772_v61  ;;  %v852_v34 = vadd.s32 %v1893_v13, %v1903_v17  ;;  %v867_v36 = vsel %vm1548_vm7, 0, %v1547_v3  ;;  %vm1013_vm8 = vcmp.gt.s32.totalorder %v1012_v8, 0 }
 0x1ae   :  { %v782_v18 = vsel %vm1959_vm3, 0, %v780_v19  ;;  %v868_v2 = vsub.s32 32, %v867_v36  ;;  %v872_v16 = vsub.s32 4294967266, %v867_v36  ;;  %v883_v59 = vsel %vm798_vm4, %v882_v4, %v1935_v23 }
 0x1af   :  { %v776_v32 = vmul.f32 %v775_v14, %v773_v12  ;;  %v954_v20 = vmul.u32 %v1926_v48, %v938_v10  ;;  %vm956_vm9 = vc.u32 %v1999_v11, %v1986_v60  ;;  %v1014_v41 = vsel %vm1013_vm8, %v1012_v8, 0 }
 0x1b0   :  { %v869_v13 = vshll.u32 %v1946_v21, %v867_v36  ;;  %v870_v17 = vshrl.u32 %v852_v34, %v868_v2  ;;  %v873_v29 = vadd.s32 127, %v872_v16  ;;  %v958_v43 = vsel %vm956_vm9, %v957_v22, %v1987_v24 }
 0x1b1   :  { %v777_v28 = vxor.u32 2147483648, %v776_v32  ;;  %v885_v31 = vsel %vm1979_vm6, 0, %v883_v59  ;;  %v959_v23 = vadd.s32 %v958_v43, %v954_v20  ;;  %v1016_v50 = vand.u32 31, %v1014_v41 }
 0x1b2   :  { %v871_v52 = vor.u32 %v870_v17, %v869_v13  ;;  %v874_v54 = vshll.u32 %v873_v29, 23  ;;  %v662_v30 = vadd.f32 %v661_v5, %v1921_v47  ;;  %v2031_v58 = vand.u32 3, %v782_v18 }
 0x1b3   :  { %v778_v46 = vsel %vm695_vm15, %v777_v28, %v776_v32  ;;  %v960_v21 = vadd.s32 536870912, %v959_v23  ;;  %v1017_v27 = vsub.s32 32, %v1016_v50  ;;  %v2033_v24 = vand.u32 3, %v885_v31 }
 0x1b4   :  { %v781_v48 = vsel %vm1959_vm3, %v1820_v1, %v778_v46  ;;  %v875_v38 = vor.u32 4788187, %v874_v54  ;;  %v1010_v62 = vor.u32 8388608, %v2009_v26  ;;  %v878_v3 = vcvt.s32.f32 %v871_v52 }
 0x1b5   :  { %1618 = vcosq.f32 %v781_v48  ;;  %v2035_v61 = vshrl.u32 %v960_v21, 30  ;;  %v1020_v39 = vshrl.u32 %v1675_v37, %v1017_v27  ;;  %v1023_v0 = vshrl.u32 %v1676_v40, %v1017_v27 }
 0x1b6   :  { %1620 = vsinq.f32 %v781_v48  ;;  %v876_v9 = vand.u32 2147483647, %v875_v38  ;;  %v1025_v4 = vshll.u32 %v1676_v40, %v1016_v50  ;;  %v1026_v47 = vshrl.u32 %v1677_v42, %v1017_v27 }
 0x1b7   :  { %v962_v6 = vshll.u32 %v2035_v61, 30  ;;  %v1015_v12 = vshrl.u32 %v1014_v41, 5  ;;  %v1019_v14 = vshll.u32 %v1674_v35, %v1016_v50  ;;  %v1022_v19 = vshll.u32 %v1675_v37, %v1016_v50 }
 0x1b8   :  { %v879_v8 = vmul.f32 %v878_v3, %v876_v9  ;;  %v1027_v10 = vor.u32 %v1026_v47, %v1025_v4  ;;  %v1028_v22 = vshll.u32 %v1677_v42, %v1016_v50  ;;  %v1029_v26 = vshrl.u32 %v1678_v45, %v1017_v27 }
 0x1b9   :  { %v2047_v32 = vsub.s32 %v959_v23, %v962_v6  ;;  %v1021_v34 = vor.u32 %v1020_v39, %v1019_v14  ;;  %v1024_v36 = vor.u32 %v1023_v0, %v1022_v19  ;;  %v1032_v18 = vshrl.u32 %v1679_v53, %v1017_v27 }
 0x1ba   :  { %vm791_vm10 = vcmp.eq.s32.totalorder %v2031_v58, 2  ;;  %v880_v2 = vxor.u32 2147483648, %v879_v8  ;;  %v1030_v16 = vor.u32 %v1029_v26, %v1028_v22  ;;  %v1031_v59 = vshll.u32 %v1678_v45, %v1016_v50 }
 0x1bb   :  { %v2053_v28 = vsub.f32 %v662_v30, %v1813_v55  ;;  %vm788_vm11 = vcmp.eq.s32.totalorder %v2031_v58, 0  ;;  %v965_v20 = vsub.s32 0, %v2047_v32  ;;  %v1018_v41 = vshrl.u32 %v1674_v35, %v1017_v27 }
 0x1bc   :  { %vm1034_vm12 = vcmp.lt.s32.totalorder %v1015_v12, 1  ;;  %vm1037_vm13 = vcmp.lt.s32.totalorder %v1015_v12, 4  ;;  %vm787_vm14 = vcmp.lt.s32.totalorder %v2031_v58, 2  ;;  %v881_v13 = vsel %vm798_vm4, %v880_v2, %v879_v8  ;;  %v568_v58 = vpop.f32.mrf.mxu0 }
 0x1bd   :  { %v1033_v17 = vor.u32 %v1032_v18, %v1031_v59  ;;  %vm1036_vm15 = vcmp.lt.s32.totalorder %v1015_v12, 3  ;;  %v1039_v29 = vsel %vm1037_vm13, %v1027_v10, 2102212464  ;;  %vm785_vm0 = vweird.f32 %v1820_v1 }
 0x1be   :  { %v884_v43 = vsel %vm1979_vm6, %v1825_v7, %v881_v13  ;;  %v1550_v46 = vmin.u32 %v965_v20, %v2047_v32  ;;  %v1038_v31 = vsel %vm1034_vm12, %v1018_v41, %v1021_v34  ;;  %v1042_v23 = vsel %vm1034_vm12, %v1021_v34, %v1024_v36 }
 0x1bf   :  { %1622 = vcosq.f32 %v884_v43  ;;  %v1040_v50 = vsel %vm1036_vm15, %v1024_v36, %v1039_v29  ;;  %v1043_v48 = vsel %vm1037_vm13, %v1030_v16, 920167782  ;;  %v1050_v5 = vshll.u32 %v1010_v62, 8 }
 0x1c0   :  { %1624 = vsinq.f32 %v884_v43  ;;  %v967_v52 = vclz %v1550_v46  ;;  %vm1035_vm1 = vcmp.lt.s32.totalorder %v1015_v12, 2  ;;  %v1044_v54 = vsel %vm1036_vm15, %v1027_v10, %v1043_v48 }
 0x1c1   :  { %v1041_v56 = vsel %vm1035_vm1, %v1038_v31, %v1040_v50  ;;  %v1045_v27 = vsel %vm1035_vm1, %v1042_v23, %v1044_v54  ;;  %v1046_v30 = vsel %vm1034_vm12, %v1024_v36, %v1027_v10  ;;  %v1047_v38 = vsel %vm1037_vm13, %v1033_v17, 1326507024  ;;  %v573_v54 = vpop.f32.mrf.mxu0 }
 0x1c2   :  { %v1619_v21 = vpop.eup %1618  ;;  %v1551_v9 = vadd.s32 4294967294, %v967_v52  ;;  %v1048_v3 = vsel %vm1036_vm15, %v1030_v16, %v1047_v38  ;;  %v1108_v4 = vand.u32 2139095040, %v2053_v28  ;;  %v1105_v26 = vand.u32 2147483647, %v2053_v28 }
 0x1c3   :  { %v1621_v39 = vpop.eup %1620  ;;  %v792_v0 = vxor.u32 2147483648, %v1619_v21  ;;  %v1049_v47 = vsel %vm1035_vm1, %v1046_v30, %v1048_v3  ;;  %v2076_v6 = vmul.u32.u64.low %v1050_v5, %v1045_v27  ;;  %v2077_v14 = vmul.u32.u64.high %v1050_v5, %v1045_v27, %v2076_v6 }
 0x1c4   :  { %v789_v62 = vxor.u32 2147483648, %v1621_v39  ;;  %vm1552_vm2 = vcmp.lt.s32.totalorder %v1551_v9, 0  ;;  %v2082_v8 = vmul.u32.u64.low %v1050_v5, %v1049_v47  ;;  %v2083_v10 = vmul.u32.u64.high %v1050_v5, %v1049_v47, %v2082_v8 }
 0x1c5   :  { %v793_v19 = vsel %vm791_vm10, %v792_v0, %v1621_v39  ;;  %v970_v12 = vsel %vm1552_vm2, 0, %v1551_v9  ;;  %v1109_v34 = vshrl.u32 %v1108_v4, 23  ;;  %v955_v18 = vadd.s32 %v1986_v60, %v1999_v11 }
 0x1c6   :  { %v790_v22 = vsel %vm788_vm11, %v1619_v21, %v789_v62  ;;  %v971_v2 = vsub.s32 32, %v970_v12  ;;  %v975_v16 = vsub.s32 4294967266, %v970_v12  ;;  %v1057_v20 = vmul.u32 %v1050_v5, %v1041_v56 }
 0x1c7   :  { %v794_v36 = vsel %vm787_vm14, %v790_v22, %v793_v19  ;;  %v1060_v41 = vadd.s32 1, %v2077_v14  ;;  %v1557_v13 = vadd.s32 4294967169, %v1109_v34  ;;  %v972_v17 = vshll.u32 %v2047_v32, %v970_v12 }
 0x1c8   :  { %v795_v59 = vsel %vm785_vm0, nan, %v794_v36  ;;  %v973_v29 = vshrl.u32 %v955_v18, %v971_v2  ;;  %v976_v43 = vadd.s32 127, %v975_v16  ;;  %vm1059_vm3 = vc.u32 %v2083_v10, %v2076_v6  ;;  %v663_v36 = vpop.f32.mrf.mxu1 }
 0x1c9   :  { %1517 = vst [vmem:[#allocation2] sm:$0xff] %v795_v59  ;;  %vm888_vm4 = vweird.f32 %v1825_v7  ;;  %vm901_vm5 = vcmp.lt.s32.totalorder %v1832_v15, 0  ;;  %v1061_v1 = vsel %vm1059_vm3, %v1060_v41, %v2077_v14  ;;  %v1115_v60 = vadd.s32 1, %v1557_v13 }
 0x1ca   :  { %vm2103_vm6 = vcmp.le.f32.partialorder %v899_v33, 0.7853982  ;;  %v974_v32 = vor.u32 %v973_v29, %v972_v17  ;;  %v977_v46 = vshll.u32 %v976_v43, 23  ;;  %v1062_v31 = vadd.s32 %v1061_v1, %v1057_v20 }
 0x1cb   :  { %vm890_vm7 = vcmp.lt.s32.totalorder %v2033_v24, 2  ;;  %vm891_vm8 = vcmp.eq.s32.totalorder %v2033_v24, 0  ;;  %v985_v23 = vsub.s32 4, %v2035_v61  ;;  %vm1116_vm9 = vcmp.gt.s32.totalorder %v1115_v60, 0 }
 0x1cc   :  { %v1623_v50 = vpop.eup %1622  ;;  %v978_v48 = vor.u32 4788187, %v977_v46  ;;  %v1063_v5 = vadd.s32 536870912, %v1062_v31  ;;  %v1112_v52 = vand.u32 8388607, %v1105_v26  ;;  %v1117_v33 = vsel %vm1116_vm9, %v1115_v60, 0 }
 0x1cd   :  { %v1625_v21 = vpop.eup %1624  ;;  %vm894_vm10 = vcmp.eq.s32.totalorder %v2033_v24, 2  ;;  %v895_v56 = vxor.u32 2147483648, %v1623_v50  ;;  %v1119_v27 = vand.u32 31, %v1117_v33  ;;  %v569_v30 = vadd.f32 %v568_v58, %v1806_v44 }
 0x1ce   :  { %v892_v38 = vxor.u32 2147483648, %v1625_v21  ;;  %v979_v39 = vand.u32 2147483647, %v978_v48  ;;  %v981_v0 = vcvt.s32.f32 %v974_v32  ;;  %v2114_v9 = vshrl.u32 %v1063_v5, 30 }
 0x1cf   :  { %v896_v3 = vsel %vm894_vm10, %v895_v56, %v1625_v21  ;;  %v2119_v4 = vsel %vm901_vm5, %v985_v23, %v2035_v61  ;;  %v1120_v62 = vsub.s32 32, %v1119_v27  ;;  %v2122_v47 = vadd.f32 %v573_v54, %v1811_v51 }
 0x1d0   :  { %v893_v14 = vsel %vm891_vm8, %v1623_v50, %v892_v38  ;;  %v982_v19 = vmul.f32 %v981_v0, %v979_v39  ;;  %v1065_v44 = vshll.u32 %v2114_v9, 30  ;;  %v1113_v8 = vor.u32 8388608, %v1112_v52 }
 0x1d1   :  { %v897_v22 = vsel %vm890_vm7, %v893_v14, %v896_v3  ;;  %v1122_v12 = vshll.u32 %v1674_v35, %v1119_v27  ;;  %v1123_v34 = vshrl.u32 %v1675_v37, %v1120_v62  ;;  %v1126_v61 = vshrl.u32 %v1676_v40, %v1120_v62 }
 0x1d2   :  { %v898_v51 = vsel %vm888_vm4, nan, %v897_v22  ;;  %v983_v18 = vxor.u32 2147483648, %v982_v19  ;;  %v2134_v2 = vsub.s32 %v1062_v31, %v1065_v44  ;;  %v1125_v16 = vshll.u32 %v1675_v37, %v1119_v27 }
 0x1d3   :  { %1518 = vst [vmem:[#allocation2 + $0x8] sm:$0xff] %v898_v51  ;;  %v988_v24 = vsel %vm2103_vm6, 0, %v2119_v4  ;;  %v1118_v59 = vshrl.u32 %v1117_v33, 5  ;;  %v1124_v20 = vor.u32 %v1123_v34, %v1122_v12  ;;  %v664_v41 = vadd.f32 %v663_v36, %v569_v30  ;;  %v668_v4 = vpop.f32.mrf.mxu1 }
 0x1d4   :  { %v984_v13 = vsel %vm901_vm5, %v983_v18, %v982_v19  ;;  %v1068_v7 = vsub.s32 0, %v2134_v2  ;;  %v1127_v17 = vor.u32 %v1126_v61, %v1125_v16  ;;  %v1129_v29 = vshrl.u32 %v1677_v42, %v1120_v62 }
 0x1d5   :  { %v987_v43 = vsel %vm2103_vm6, %v1832_v15, %v984_v13  ;;  %v1128_v58 = vshll.u32 %v1676_v40, %v1119_v27  ;;  %v1131_v1 = vshll.u32 %v1677_v42, %v1119_v27  ;;  %v1132_v60 = vshrl.u32 %v1678_v45, %v1120_v62 }
 0x1d6   :  { %1626 = vcosq.f32 %v987_v43  ;;  %v1058_v32 = vadd.s32 %v2076_v6, %v2083_v10  ;;  %v1554_v46 = vmin.u32 %v1068_v7, %v2134_v2  ;;  %v1153_v31 = vshll.u32 %v1113_v8, 8 }
 0x1d7   :  { %1628 = vsinq.f32 %v987_v43  ;;  %v1130_v23 = vor.u32 %v1129_v29, %v1128_v58  ;;  %v1133_v50 = vor.u32 %v1132_v60, %v1131_v1  ;;  %v2154_v48 = vsub.f32 %v664_v41, %v1817_v63 }
 0x1d8   :  { %v1070_v11 = vclz %v1554_v46  ;;  %v1134_v5 = vshll.u32 %v1678_v45, %v1119_v27  ;;  %v1135_v52 = vshrl.u32 %v1679_v53, %v1120_v62  ;;  %vm1137_vm11 = vcmp.lt.s32.totalorder %v1118_v59, 1 }
 0x1d9   :  { %v1121_v33 = vshrl.u32 %v1674_v35, %v1120_v62  ;;  %vm1139_vm12 = vcmp.lt.s32.totalorder %v1118_v59, 3  ;;  %vm1140_vm13 = vcmp.lt.s32.totalorder %v1118_v59, 4  ;;  %v1145_v6 = vsel %vm1137_vm11, %v1124_v20, %v1127_v17 }
 0x1da   :  { %v1555_v10 = vadd.s32 4294967294, %v1070_v11  ;;  %v1136_v54 = vor.u32 %v1135_v52, %v1134_v5  ;;  %v1142_v21 = vsel %vm1140_vm13, %v1130_v23, 2102212464  ;;  %v1146_v56 = vsel %vm1140_vm13, %v1133_v50, 920167782 }
 0x1db   :  { %vm1138_vm14 = vcmp.lt.s32.totalorder %v1118_v59, 2  ;;  %v1141_v30 = vsel %vm1137_vm11, %v1121_v33, %v1124_v20  ;;  %v1147_v38 = vsel %vm1139_vm12, %v1130_v23, %v1146_v56  ;;  %v1149_v39 = vsel %vm1137_vm11, %v1127_v17, %v1130_v23 }
 0x1dc   :  { %vm1556_vm15 = vcmp.lt.s32.totalorder %v1555_v10, 0  ;;  %v1143_v27 = vsel %vm1139_vm12, %v1127_v17, %v1142_v21  ;;  %v1148_v0 = vsel %vm1138_vm14, %v1145_v6, %v1147_v38  ;;  %v1150_v3 = vsel %vm1140_vm13, %v1136_v54, 1326507024 }
 0x1dd   :  { %v1073_v62 = vsel %vm1556_vm15, 0, %v1555_v10  ;;  %v1151_v14 = vsel %vm1139_vm12, %v1133_v50, %v1150_v3  ;;  %v2163_v19 = vmul.u32.u64.low %v1153_v31, %v1148_v0  ;;  %v2164_v44 = vmul.u32.u64.high %v1153_v31, %v1148_v0, %v2163_v19 }
 0x1de   :  { %v1074_v8 = vsub.s32 32, %v1073_v62  ;;  %v1078_v22 = vsub.s32 4294967266, %v1073_v62  ;;  %v1152_v12 = vsel %vm1138_vm14, %v1149_v39, %v1151_v14  ;;  %v669_v34 = vadd.f32 %v668_v4, %v2122_v47 }
 0x1df   :  { %v992_v61 = vand.u32 3, %v988_v24  ;;  %v1144_v51 = vsel %vm1138_vm14, %v1141_v30, %v1143_v27  ;;  %v2170_v36 = vmul.u32.u64.low %v1153_v31, %v1152_v12  ;;  %v2171_v18 = vmul.u32.u64.high %v1153_v31, %v1152_v12, %v2170_v36  ;;  %v575_v27 = vpop.f32.mrf.mxu0 }
 0x1e0   :  { %v1075_v16 = vshll.u32 %v2134_v2, %v1073_v62  ;;  %v1076_v20 = vshrl.u32 %v1058_v32, %v1074_v8  ;;  %v1079_v41 = vadd.s32 127, %v1078_v22  ;;  %v1211_v13 = vand.u32 2139095040, %v2154_v48 }
 0x1e1   :  { %vm1004_vm0 = vcmp.lt.s32.totalorder %v1908_v25, 0  ;;  %v1163_v7 = vadd.s32 1, %v2164_v44  ;;  %v2178_v47 = vsub.f32 %v669_v34, %v1813_v55  ;;  %vm994_vm1 = vcmp.eq.s32.totalorder %v992_v61, 0 }
 0x1e2   :  { %v1077_v17 = vor.u32 %v1076_v20, %v1075_v16  ;;  %v1080_v29 = vshll.u32 %v1079_v41, 23  ;;  %v1212_v43 = vshrl.u32 %v1211_v13, 23  ;;  %vm997_vm2 = vcmp.eq.s32.totalorder %v992_v61, 2 }
 0x1e3   :  { %v1627_v24 = vpop.eup %1626  ;;  %v1160_v59 = vmul.u32 %v1153_v31, %v1144_v51  ;;  %vm1162_vm3 = vc.u32 %v2171_v18, %v2163_v19  ;;  %v1088_v60 = vsub.s32 4, %v2114_v9  ;;  %v1208_v50 = vand.u32 2147483647, %v2154_v48 }
 0x1e4   :  { %v1629_v2 = vpop.eup %1628  ;;  %v998_v58 = vxor.u32 2147483648, %v1627_v24  ;;  %v1081_v1 = vor.u32 4788187, %v1080_v29  ;;  %v1164_v32 = vsel %vm1162_vm3, %v1163_v7, %v2164_v44  ;;  %v1561_v55 = vadd.s32 4294967169, %v1212_v43 }
 0x1e5   :  { %v995_v46 = vxor.u32 2147483648, %v1629_v2  ;;  %v1165_v23 = vadd.s32 %v1164_v32, %v1160_v59  ;;  %v1084_v52 = vcvt.s32.f32 %v1077_v17  ;;  %v1314_v31 = vand.u32 2139095040, %v2178_v47 }
 0x1e6   :  { %v999_v11 = vsel %vm997_vm2, %v998_v58, %v1629_v2  ;;  %v1082_v5 = vand.u32 2147483647, %v1081_v1  ;;  %vm993_vm4 = vcmp.lt.s32.totalorder %v992_v61, 2  ;;  %v1218_v10 = vadd.s32 1, %v1561_v55 }
 0x1e7   :  { %v996_v33 = vsel %vm994_vm1, %v1627_v24, %v995_v46  ;;  %v1166_v6 = vadd.s32 536870912, %v1165_v23  ;;  %vm991_vm5 = vweird.f32 %v1832_v15  ;;  %v1089_v56 = vsel %vm1004_vm0, %v1088_v60, %v2114_v9 }
 0x1e8   :  { %v1000_v54 = vsel %vm993_vm4, %v996_v33, %v999_v11  ;;  %v1085_v21 = vmul.f32 %v1084_v52, %v1082_v5  ;;  %v1215_v39 = vand.u32 8388607, %v1208_v50  ;;  %vm1219_vm6 = vcmp.gt.s32.totalorder %v1218_v10, 0 }
 0x1e9   :  { %v1001_v30 = vsel %vm991_vm5, nan, %v1000_v54  ;;  %v2191_v38 = vshrl.u32 %v1166_v6, 30  ;;  %vm1003_vm7 = vcmp.le.f32.partialorder %v1002_v49, 0.7853982  ;;  %v1220_v15 = vsel %vm1219_vm6, %v1218_v10, 0 }
 0x1ea   :  { %1519 = vst [vmem:[#allocation2 + $0x10] sm:$0xff] %v1001_v30  ;;  %v1086_v0 = vxor.u32 2147483648, %v1085_v21  ;;  %v1315_v3 = vshrl.u32 %v1314_v31, 23  ;;  %v1091_v4 = vsel %vm1003_vm7, 0, %v1089_v56  ;;  %v1222_v14 = vand.u32 31, %v1220_v15 }
 0x1eb   :  { %v1168_v62 = vshll.u32 %v2191_v38, 30  ;;  %v1311_v44 = vand.u32 2147483647, %v2178_v47  ;;  %v2202_v8 = vadd.f32 %v575_v27, %v1815_v57  ;;  %v1216_v49 = vor.u32 8388608, %v1215_v39 }
 0x1ec   :  { %v1087_v9 = vsel %vm1004_vm0, %v1086_v0, %v1085_v21  ;;  %v1223_v34 = vsub.s32 32, %v1222_v14  ;;  %v2207_v61 = vand.u32 3, %v1091_v4  ;;  %v2209_v51 = vshrl.u32 %v1220_v15, 5 }
 0x1ed   :  { %v1090_v22 = vsel %vm1003_vm7, %v1908_v25, %v1087_v9  ;;  %v2205_v12 = vsub.s32 %v1165_v23, %v1168_v62  ;;  %v1565_v36 = vadd.s32 4294967169, %v1315_v3  ;;  %v1225_v20 = vshll.u32 %v1674_v35, %v1222_v14 }
 0x1ee   :  { %1630 = vcosq.f32 %v1090_v22  ;;  %v1228_v57 = vshll.u32 %v1675_v37, %v1222_v14  ;;  %v1226_v41 = vshrl.u32 %v1675_v37, %v1223_v34  ;;  %v1229_v13 = vshrl.u32 %v1676_v40, %v1223_v34 }
 0x1ef   :  { %1632 = vsinq.f32 %v1090_v22  ;;  %v1171_v16 = vsub.s32 0, %v2205_v12  ;;  %v1231_v7 = vshll.u32 %v1676_v40, %v1222_v14  ;;  %v1232_v17 = vshrl.u32 %v1677_v42, %v1223_v34 }
 0x1f0   :  { %v1161_v29 = vadd.s32 %v2163_v19, %v2171_v18  ;;  %v2221_v24 = vshll.u32 %v1216_v49, 8  ;;  %v2225_v59 = vand.u32 8388607, %v1311_v44  ;;  %v1227_v2 = vor.u32 %v1226_v41, %v1225_v20 }
 0x1f1   :  { %v1558_v43 = vmin.u32 %v1171_v16, %v2205_v12  ;;  %v1230_v58 = vor.u32 %v1229_v13, %v1228_v57  ;;  %v1233_v1 = vor.u32 %v1232_v17, %v1231_v7  ;;  %v1234_v60 = vshll.u32 %v1677_v42, %v1222_v14 }
 0x1f2   :  { %v1235_v46 = vshrl.u32 %v1678_v45, %v1223_v34  ;;  %v1237_v23 = vshll.u32 %v1678_v45, %v1222_v14  ;;  %v1238_v19 = vshrl.u32 %v1679_v53, %v1223_v34  ;;  %v1224_v18 = vshrl.u32 %v1674_v35, %v1223_v34 }
 0x1f3   :  { %v1173_v32 = vclz %v1558_v43  ;;  %vm1240_vm8 = vcmp.lt.s32.totalorder %v2209_v51, 1  ;;  %vm1241_vm9 = vcmp.lt.s32.totalorder %v2209_v51, 2  ;;  %v1321_v55 = vadd.s32 1, %v1565_v36  ;;  %v670_v43 = vpop.f32.mrf.mxu1 }
 0x1f4   :  { %v1236_v5 = vor.u32 %v1235_v46, %v1234_v60  ;;  %v1239_v52 = vor.u32 %v1238_v19, %v1237_v23  ;;  %vm1243_vm10 = vcmp.lt.s32.totalorder %v2209_v51, 4  ;;  %vm1242_vm11 = vcmp.lt.s32.totalorder %v2209_v51, 3 }
 0x1f5   :  { %v1559_v11 = vadd.s32 4294967294, %v1173_v32  ;;  %v1244_v31 = vsel %vm1240_vm8, %v1224_v18, %v1227_v2  ;;  %v1245_v33 = vsel %vm1243_vm10, %v1233_v1, 2102212464  ;;  %v1248_v6 = vsel %vm1240_vm8, %v1227_v2, %v1230_v58 }
 0x1f6   :  { %v1249_v10 = vsel %vm1243_vm10, %v1236_v5, 920167782  ;;  %v1252_v54 = vsel %vm1240_vm8, %v1230_v58, %v1233_v1  ;;  %v1253_v21 = vsel %vm1243_vm10, %v1239_v52, 1326507024  ;;  %vm1094_vm13 = vweird.f32 %v1908_v25 }
 0x1f7   :  { %vm1560_vm12 = vcmp.lt.s32.totalorder %v1559_v11, 0  ;;  %v1250_v30 = vsel %vm1242_vm11, %v1233_v1, %v1249_v10  ;;  %v1254_v39 = vsel %vm1242_vm11, %v1236_v5, %v1253_v21  ;;  %vm1322_vm14 = vcmp.gt.s32.totalorder %v1321_v55, 0 }
 0x1f8   :  { %v1176_v56 = vsel %vm1560_vm12, 0, %v1559_v11  ;;  %v1246_v15 = vsel %vm1242_vm11, %v1230_v58, %v1245_v33  ;;  %v1251_v3 = vsel %vm1241_vm9, %v1248_v6, %v1250_v30  ;;  %v1255_v62 = vsel %vm1241_vm9, %v1252_v54, %v1254_v39 }
 0x1f9   :  { %v1177_v27 = vsub.s32 32, %v1176_v56  ;;  %v1181_v0 = vsub.s32 4294967266, %v1176_v56  ;;  %v1178_v4 = vshll.u32 %v2205_v12, %v1176_v56  ;;  %vm1096_vm15 = vcmp.lt.s32.totalorder %v2207_v61, 2 }
 0x1fa   :  { %v2243_v14 = vmul.u32.u64.low %v2221_v24, %v1251_v3  ;;  %v2244_v9 = vmul.u32.u64.high %v2221_v24, %v1251_v3, %v2243_v14  ;;  %v2248_v36 = vmul.u32.u64.low %v2221_v24, %v1255_v62  ;;  %v2249_v16 = vmul.u32.u64.high %v2221_v24, %v1255_v62, %v2248_v36 }
 0x1fb   :  { %v1631_v22 = vpop.eup %1630  ;;  %v1179_v49 = vshrl.u32 %v1161_v29, %v1177_v27  ;;  %v1182_v34 = vadd.s32 127, %v1181_v0  ;;  %vm1100_vm0 = vcmp.eq.s32.totalorder %v2207_v61, 2  ;;  %v1323_v57 = vsel %vm1322_vm14, %v1321_v55, 0 }
 0x1fc   :  { %v1633_v20 = vpop.eup %1632  ;;  %v1101_v12 = vxor.u32 2147483648, %v1631_v22  ;;  %v1247_v17 = vsel %vm1241_vm9, %v1244_v31, %v1246_v15  ;;  %vm1097_vm1 = vcmp.eq.s32.totalorder %v2207_v61, 0  ;;  %vm1107_vm2 = vcmp.lt.s32.totalorder %v2053_v28, 0 }
 0x1fd   :  { %v1098_v41 = vxor.u32 2147483648, %v1633_v20  ;;  %v1180_v13 = vor.u32 %v1179_v49, %v1178_v4  ;;  %v1183_v7 = vshll.u32 %v1182_v34, 23  ;;  %v1266_v2 = vadd.s32 1, %v2244_v9 }
 0x1fe   :  { %v1102_v29 = vsel %vm1100_vm0, %v1101_v12, %v1633_v20  ;;  %v1325_v58 = vand.u32 31, %v1323_v57  ;;  %vm2261_vm3 = vcmp.le.f32.partialorder %v1105_v26, 0.7853982  ;;  %v1319_v51 = vor.u32 8388608, %v2225_v59 }
 0x1ff   :  { %v1099_v1 = vsel %vm1097_vm1, %v1631_v22, %v1098_v41  ;;  %v1184_v32 = vor.u32 4788187, %v1183_v7  ;;  %v671_v46 = vadd.f32 %v670_v43, %v2202_v8  ;;  %v1263_v19 = vmul.u32 %v2221_v24, %v1247_v17 }
 0x200   :  { %v1103_v23 = vsel %vm1096_vm15, %v1099_v1, %v1102_v29  ;;  %vm1265_vm4 = vc.u32 %v2249_v16, %v2243_v14  ;;  %v1326_v18 = vsub.s32 32, %v1325_v58  ;;  %v1187_v11 = vcvt.s32.f32 %v1180_v13 }
 0x201   :  { %v1104_v26 = vsel %vm1094_vm13, nan, %v1103_v23  ;;  %v1185_v55 = vand.u32 2147483647, %v1184_v32  ;;  %v1267_v5 = vsel %vm1265_vm4, %v1266_v2, %v2244_v9  ;;  %v1324_v52 = vshrl.u32 %v1323_v57, 5 }
 0x202   :  { %1520 = vst [vmem:[#allocation2 + $0x18] sm:$0xff] %v1104_v26  ;;  %v1268_v59 = vadd.s32 %v1267_v5, %v1263_v19  ;;  %v1329_v8 = vshrl.u32 %v1675_v37, %v1326_v18  ;;  %v1332_v61 = vshrl.u32 %v1676_v40, %v1326_v18  ;;  %v1328_v24 = vshll.u32 %v1674_v35, %v1325_v58 }
 0x203   :  { %v1188_v31 = vmul.f32 %v1187_v11, %v1185_v55  ;;  %v1331_v33 = vshll.u32 %v1675_v37, %v1325_v58  ;;  %v1335_v6 = vshrl.u32 %v1677_v42, %v1326_v18  ;;  %v1334_v10 = vshll.u32 %v1676_v40, %v1325_v58 }
 0x204   :  { %v1269_v25 = vadd.s32 536870912, %v1268_v59  ;;  %v1337_v54 = vshll.u32 %v1677_v42, %v1325_v58  ;;  %v1338_v21 = vshrl.u32 %v1678_v45, %v1326_v18  ;;  %v1330_v30 = vor.u32 %v1329_v8, %v1328_v24 }
 0x205   :  { %v1189_v56 = vxor.u32 2147483648, %v1188_v31  ;;  %v1333_v39 = vor.u32 %v1332_v61, %v1331_v33  ;;  %v1341_v27 = vshrl.u32 %v1679_v53, %v1326_v18  ;;  %v1191_v0 = vsub.s32 4, %v2191_v38 }
 0x206   :  { %v2285_v15 = vshrl.u32 %v1269_v25, 30  ;;  %v1339_v3 = vor.u32 %v1338_v21, %v1337_v54  ;;  %v1340_v4 = vshll.u32 %v1678_v45, %v1325_v58  ;;  %v1336_v9 = vor.u32 %v1335_v6, %v1334_v10 }
 0x207   :  { %v1190_v62 = vsel %vm1107_vm2, %v1189_v56, %v1188_v31  ;;  %vm1343_vm5 = vcmp.lt.s32.totalorder %v1324_v52, 1  ;;  %v1359_v22 = vshll.u32 %v1319_v51, 8  ;;  %vm1346_vm6 = vcmp.lt.s32.totalorder %v1324_v52, 4 }
 0x208   :  { %v1193_v49 = vsel %vm2261_vm3, %v2053_v28, %v1190_v62  ;;  %v1271_v34 = vshll.u32 %v2285_v15, 30  ;;  %v1342_v36 = vor.u32 %v1341_v27, %v1340_v4  ;;  %v1351_v20 = vsel %vm1343_vm5, %v1330_v30, %v1333_v39 }
 0x209   :  { %1634 = vcosq.f32 %v1193_v49  ;;  %v1352_v12 = vsel %vm1346_vm6, %v1339_v3, 920167782  ;;  %v2297_v57 = vsub.f32 %v671_v46, %v1817_v63  ;;  %v1192_v41 = vsel %vm1107_vm2, %v1191_v0, %v2191_v38 }
 0x20a   :  { %1636 = vsinq.f32 %v1193_v49  ;;  %v1272_v13 = vsub.s32 %v1268_v59, %v1271_v34  ;;  %vm1345_vm7 = vcmp.lt.s32.totalorder %v1324_v52, 3  ;;  %v1327_v7 = vshrl.u32 %v1674_v35, %v1326_v18 }
 0x20b   :  { %vm1344_vm8 = vcmp.lt.s32.totalorder %v1324_v52, 2  ;;  %v1348_v17 = vsel %vm1346_vm6, %v1336_v9, 2102212464  ;;  %v1353_v29 = vsel %vm1345_vm7, %v1336_v9, %v1352_v12  ;;  %v1355_v58 = vsel %vm1343_vm5, %v1333_v39, %v1336_v9 }
 0x20c   :  { %v1274_v43 = vsub.s32 0, %v1272_v13  ;;  %v1354_v2 = vsel %vm1344_vm8, %v1351_v20, %v1353_v29  ;;  %v1356_v63 = vsel %vm1346_vm6, %v1342_v36, 1326507024  ;;  %v1194_v1 = vsel %vm2261_vm3, 0, %v1192_v41 }
 0x20d   :  { %v1357_v38 = vsel %vm1345_vm7, %v1339_v3, %v1356_v63  ;;  %v2309_v32 = vmul.u32.u64.low %v1359_v22, %v1354_v2  ;;  %v2310_v51 = vmul.u32.u64.high %v1359_v22, %v1354_v2, %v2309_v32  ;;  %v1347_v23 = vsel %vm1343_vm5, %v1327_v7, %v1330_v30 }
 0x20e   :  { %v1562_v46 = vmin.u32 %v1274_v43, %v1272_v13  ;;  %v1349_v19 = vsel %vm1345_vm7, %v1333_v39, %v1348_v17  ;;  %v1358_v18 = vsel %vm1344_vm8, %v1355_v58, %v1357_v38  ;;  %v1417_v26 = vand.u32 2139095040, %v2297_v57 }
 0x20f   :  { %v1198_v55 = vand.u32 3, %v1194_v1  ;;  %v2316_v5 = vmul.u32.u64.low %v1359_v22, %v1358_v18  ;;  %v2317_v59 = vmul.u32.u64.high %v1359_v22, %v1358_v18, %v2316_v5  ;;  %v1350_v60 = vsel %vm1344_vm8, %v1347_v23, %v1349_v19 }
 0x210   :  { %v1276_v11 = vclz %v1562_v46  ;;  %v1369_v8 = vadd.s32 1, %v2310_v51  ;;  %v1418_v61 = vshrl.u32 %v1417_v26, 23  ;;  %v1366_v33 = vmul.u32 %v1359_v22, %v1350_v60 }
 0x211   :  { %vm1199_vm9 = vcmp.lt.s32.totalorder %v1198_v55, 2  ;;  %vm1368_vm11 = vc.u32 %v2317_v59, %v2309_v32  ;;  %v1414_v10 = vand.u32 2147483647, %v2297_v57  ;;  %v1264_v52 = vadd.s32 %v2243_v14, %v2249_v16 }
 0x212   :  { %v1563_v31 = vadd.s32 4294967294, %v1276_v11  ;;  %v1569_v24 = vadd.s32 4294967169, %v1418_v61  ;;  %v1370_v25 = vsel %vm1368_vm11, %v1369_v8, %v2310_v51  ;;  %vm1203_vm12 = vcmp.eq.s32.totalorder %v1198_v55, 2 }
 0x213   :  { %v1371_v39 = vadd.s32 %v1370_v25, %v1366_v33  ;;  %vm1200_vm14 = vcmp.eq.s32.totalorder %v1198_v55, 0  ;;  %v1421_v34 = vand.u32 8388607, %v1414_v10  ;;  %vm1197_vm15 = vweird.f32 %v2053_v28 }
 0x214   :  { %vm1564_vm10 = vcmp.lt.s32.totalorder %v1563_v31, 0  ;;  %v1424_v54 = vadd.s32 1, %v1569_v24  ;;  %vm2337_vm0 = vcmp.le.f32.partialorder %v1208_v50, 0.7853982  ;;  %vm1210_vm1 = vcmp.lt.s32.totalorder %v2154_v48, 0 }
 0x215   :  { %v1279_v6 = vsel %vm1564_vm10, 0, %v1563_v31  ;;  %v1372_v22 = vadd.s32 536870912, %v1371_v39  ;;  %v1422_v38 = vor.u32 8388608, %v1421_v34  ;;  %v1367_v61 = vadd.s32 %v2309_v32, %v2317_v59 }
 0x216   :  { %v1635_v21 = vpop.eup %1634  ;;  %v1280_v56 = vsub.s32 32, %v1279_v6  ;;  %v1284_v30 = vsub.s32 4294967266, %v1279_v6  ;;  %v1281_v3 = vshll.u32 %v1272_v13, %v1279_v6  ;;  %vm1425_vm13 = vcmp.gt.s32.totalorder %v1424_v54, 0 }
 0x217   :  { %v1637_v27 = vpop.eup %1636  ;;  %v1204_v0 = vxor.u32 2147483648, %v1635_v21  ;;  %v1426_v36 = vsel %vm1425_vm13, %v1424_v54, 0  ;;  %v2329_v12 = vshrl.u32 %v1372_v22, 30  ;;  %v1294_v13 = vsub.s32 4, %v2285_v15 }
 0x218   :  { %v1201_v4 = vxor.u32 2147483648, %v1637_v27  ;;  %v1282_v62 = vshrl.u32 %v1264_v52, %v1280_v56  ;;  %v1285_v9 = vadd.s32 127, %v1284_v30  ;;  %v1428_v7 = vand.u32 31, %v1426_v36 }
 0x219   :  { %v1205_v49 = vsel %vm1203_vm12, %v1204_v0, %v1637_v27  ;;  %v1374_v43 = vshll.u32 %v2329_v12, 30  ;;  %v2345_v51 = vsel %vm1210_vm1, %v1294_v13, %v2285_v15  ;;  %v1427_v46 = vshrl.u32 %v1426_v36, 5 }
 0x21a   :  { %v1202_v20 = vsel %vm1200_vm14, %v1635_v21, %v1201_v4  ;;  %v1283_v14 = vor.u32 %v1282_v62, %v1281_v3  ;;  %v1286_v16 = vshll.u32 %v1285_v9, 23  ;;  %v1429_v58 = vsub.s32 32, %v1428_v7 }
 0x21b   :  { %v1206_v41 = vsel %vm1199_vm9, %v1202_v20, %v1205_v49  ;;  %v1375_v1 = vsub.s32 %v1371_v39, %v1374_v43  ;;  %v1431_v26 = vshll.u32 %v1674_v35, %v1428_v7  ;;  %v1434_v11 = vshll.u32 %v1675_v37, %v1428_v7 }
 0x21c   :  { %v1207_v17 = vsel %vm1197_vm15, nan, %v1206_v41  ;;  %v1287_v29 = vor.u32 4788187, %v1286_v16  ;;  %v1290_v63 = vcvt.s32.f32 %v1283_v14  ;;  %v1432_v23 = vshrl.u32 %v1675_v37, %v1429_v58 }
 0x21d   :  { %1521 = vst [vmem:[#allocation2 + $0x20] sm:$0xff] %v1207_v17  ;;  %v1435_v50 = vshrl.u32 %v1676_v40, %v1429_v58  ;;  %v1377_v18 = vsub.s32 0, %v1375_v1  ;;  %v1438_v55 = vshrl.u32 %v1677_v42, %v1429_v58  ;;  %v1437_v5 = vshll.u32 %v1676_v40, %v1428_v7 }
 0x21e   :  { %v1288_v28 = vand.u32 2147483647, %v1287_v29  ;;  %v1440_v60 = vshll.u32 %v1677_v42, %v1428_v7  ;;  %v1441_v15 = vshrl.u32 %v1678_v45, %v1429_v58  ;;  %v1462_v24 = vshll.u32 %v1422_v38, 8 }
 0x21f   :  { %v1566_v31 = vmin.u32 %v1377_v18, %v1375_v1  ;;  %v1433_v33 = vor.u32 %v1432_v23, %v1431_v26  ;;  %v1436_v6 = vor.u32 %v1435_v50, %v1434_v11  ;;  %v1439_v25 = vor.u32 %v1438_v55, %v1437_v5 }
 0x220   :  { %v1291_v19 = vmul.f32 %v1290_v63, %v1288_v28  ;;  %v1442_v54 = vor.u32 %v1441_v15, %v1440_v60  ;;  %v1443_v40 = vshll.u32 %v1678_v45, %v1428_v7  ;;  %v1444_v42 = vshrl.u32 %v1679_v53, %v1429_v58 }
 0x221   :  { %v1379_v37 = vclz %v1566_v31  ;;  %v1430_v32 = vshrl.u32 %v1674_v35, %v1429_v58  ;;  %vm1446_vm2 = vcmp.lt.s32.totalorder %v1427_v46, 1  ;;  %vm1448_vm3 = vcmp.lt.s32.totalorder %v1427_v46, 3 }
 0x222   :  { %v1292_v8 = vxor.u32 2147483648, %v1291_v19  ;;  %v1445_v56 = vor.u32 %v1444_v42, %v1443_v40  ;;  %vm1449_vm4 = vcmp.lt.s32.totalorder %v1427_v46, 4  ;;  %v1454_v39 = vsel %vm1446_vm2, %v1433_v33, %v1436_v6 }
 0x223   :  { %v1567_v59 = vadd.s32 4294967294, %v1379_v37  ;;  %v1451_v30 = vsel %vm1449_vm4, %v1439_v25, 2102212464  ;;  %v1455_v27 = vsel %vm1449_vm4, %v1442_v54, 920167782  ;;  %vm1447_vm6 = vcmp.lt.s32.totalorder %v1427_v46, 2 }
 0x224   :  { %v1293_v21 = vsel %vm1210_vm1, %v1292_v8, %v1291_v19  ;;  %v1456_v45 = vsel %vm1448_vm3, %v1439_v25, %v1455_v27  ;;  %v1458_v53 = vsel %vm1446_vm2, %v1436_v6, %v1439_v25  ;;  %v1450_v3 = vsel %vm1446_vm2, %v1430_v32, %v1433_v33 }
 0x225   :  { %v1296_v52 = vsel %vm2337_vm0, %v2154_v48, %v1293_v21  ;;  %vm1568_vm5 = vcmp.lt.s32.totalorder %v1567_v59, 0  ;;  %v1457_v4 = vsel %vm1447_vm6, %v1454_v39, %v1456_v45  ;;  %v1459_v35 = vsel %vm1449_vm4, %v1445_v56, 1326507024 }
 0x226   :  { %1638 = vcosq.f32 %v1296_v52  ;;  %v1382_v0 = vsel %vm1568_vm5, 0, %v1567_v59  ;;  %v1452_v22 = vsel %vm1448_vm3, %v1436_v6, %v1451_v30  ;;  %v1460_v49 = vsel %vm1448_vm3, %v1442_v54, %v1459_v35 }
 0x227   :  { %1640 = vsinq.f32 %v1296_v52  ;;  %v1383_v62 = vsub.s32 32, %v1382_v0  ;;  %v1387_v9 = vsub.s32 4294967266, %v1382_v0  ;;  %v1384_v34 = vshll.u32 %v1375_v1, %v1382_v0 }
 0x228   :  { %v1461_v36 = vsel %vm1447_vm6, %v1458_v53, %v1460_v49  ;;  %v2370_v20 = vmul.u32.u64.low %v1462_v24, %v1457_v4  ;;  %v2371_v14 = vmul.u32.u64.high %v1462_v24, %v1457_v4, %v2370_v20  ;;  %v1453_v17 = vsel %vm1447_vm6, %v1450_v3, %v1452_v22 }
 0x229   :  { %v1385_v16 = vshrl.u32 %v1367_v61, %v1383_v62  ;;  %v1388_v41 = vadd.s32 127, %v1387_v9  ;;  %v2373_v13 = vmul.u32.u64.low %v1462_v24, %v1461_v36  ;;  %v2374_v7 = vmul.u32.u64.high %v1462_v24, %v1461_v36, %v2373_v13 }
 0x22a   :  { %v1297_v29 = vsel %vm2337_vm0, 0, %v2345_v51  ;;  %v1472_v28 = vadd.s32 1, %v2371_v14  ;;  %v1469_v1 = vmul.u32 %v1462_v24, %v1453_v17  ;;  %vm1300_vm10 = vweird.f32 %v2154_v48 }
 0x22b   :  { %v1386_v43 = vor.u32 %v1385_v16, %v1384_v34  ;;  %v1389_v58 = vshll.u32 %v1388_v41, 23  ;;  %vm1471_vm7 = vc.u32 %v2374_v7, %v2370_v20  ;;  %v1301_v38 = vand.u32 3, %v1297_v29 }
 0x22c   :  { %v1473_v23 = vsel %vm1471_vm7, %v1472_v28, %v2371_v14  ;;  %vm1313_vm12 = vcmp.lt.s32.totalorder %v2178_v47, 0  ;;  %vm2387_vm13 = vcmp.le.f32.partialorder %v1311_v44, 0.7853982  ;;  %v1397_v54 = vsub.s32 4, %v2329_v12 }
 0x22d   :  { %v1390_v63 = vor.u32 4788187, %v1389_v58  ;;  %v1393_v19 = vcvt.s32.f32 %v1386_v43  ;;  %v1474_v18 = vadd.s32 %v1473_v23, %v1469_v1  ;;  %vm1306_vm8 = vcmp.eq.s32.totalorder %v1301_v38, 2 }
 0x22e   :  { %vm1303_vm9 = vcmp.eq.s32.totalorder %v1301_v38, 0  ;;  %vm1302_vm11 = vcmp.lt.s32.totalorder %v1301_v38, 2  ;;  %v1398_v44 = vsel %vm1313_vm12, %v1397_v54, %v2329_v12  ;;  %v1470_v56 = vadd.s32 %v2370_v20, %v2374_v7 }
 0x22f   :  { %v1391_v50 = vand.u32 2147483647, %v1390_v63  ;;  %v1475_v2 = vadd.s32 536870912, %v1474_v18  ;;  %v1400_v42 = vsel %vm2387_vm13, 0, %v1398_v44  ;;  %vm1403_vm2 = vweird.f32 %v2178_v47 }
 0x230   :  { %v1404_v32 = vand.u32 3, %v1400_v42  ;;  %vm1416_vm3 = vcmp.lt.s32.totalorder %v2297_v57, 0  ;;  %vm1415_vm4 = vcmp.le.f32.partialorder %v1414_v10, 0.7853982 }
 0x231   :  { %v1394_v11 = vmul.f32 %v1393_v19, %v1391_v50  ;;  %v1476_v15 = vshrl.u32 %v1475_v2, 30 }
 0x232   :  { %vm1409_vm15 = vcmp.eq.s32.totalorder %v1404_v32, 2  ;;  %vm1406_vm0 = vcmp.eq.s32.totalorder %v1404_v32, 0  ;;  %vm1405_vm1 = vcmp.lt.s32.totalorder %v1404_v32, 2 }
 0x233   :  { %v1639_v46 = vpop.eup %1638  ;;  %v1395_v60 = vxor.u32 2147483648, %v1394_v11  ;;  %v1477_v33 = vshll.u32 %v1476_v15, 30  ;;  %v1500_v17 = vsub.s32 4, %v1476_v15 }
 0x234   :  { %v1641_v26 = vpop.eup %1640  ;;  %v1307_v55 = vxor.u32 2147483648, %v1639_v46 }
 0x235   :  { %v1304_v51 = vxor.u32 2147483648, %v1641_v26  ;;  %v1396_v24 = vsel %vm1313_vm12, %v1395_v60, %v1394_v11  ;;  %v1478_v48 = vsub.s32 %v1474_v18, %v1477_v33 }
 0x236   :  { %v1308_v5 = vsel %vm1306_vm8, %v1307_v55, %v1641_v26  ;;  %v1399_v25 = vsel %vm2387_vm13, %v2178_v47, %v1396_v24  ;;  %v1501_v47 = vsel %vm1416_vm3, %v1500_v17, %v1476_v15  ;;  %vm1506_vm8 = vweird.f32 %v2297_v57 }
 0x237   :  { %v1305_v8 = vsel %vm1303_vm9, %v1639_v46, %v1304_v51  ;;  %1642 = vcosq.f32 %v1399_v25  ;;  %v1480_v21 = vsub.s32 0, %v1478_v48  ;;  %v1503_v29 = vsel %vm1415_vm4, 0, %v1501_v47 }
 0x238   :  { %v1309_v61 = vsel %vm1302_vm11, %v1305_v8, %v1308_v5  ;;  %1644 = vsinq.f32 %v1399_v25  ;;  %v1507_v43 = vand.u32 3, %v1503_v29 }
 0x239   :  { %v1310_v6 = vsel %vm1300_vm10, nan, %v1309_v61  ;;  %v1570_v37 = vmin.u32 %v1480_v21, %v1478_v48 }
 0x23a   :  { %1522 = vst [vmem:[#allocation2 + $0x28] sm:$0xff] %v1310_v6  ;;  %vm1512_vm5 = vcmp.eq.s32.totalorder %v1507_v43, 2  ;;  %vm1509_vm6 = vcmp.eq.s32.totalorder %v1507_v43, 0  ;;  %vm1508_vm7 = vcmp.lt.s32.totalorder %v1507_v43, 2 }
 0x23b   :  { %v1482_v40 = vclz %v1570_v37 }
 0x23d   :  { %v1571_v52 = vadd.s32 4294967294, %v1482_v40 }
 0x23f   :  { %vm1572_vm14 = vcmp.lt.s32.totalorder %v1571_v52, 0 }
 0x240   :  { %v1485_v59 = vsel %vm1572_vm14, 0, %v1571_v52 }
 0x241   :  { %v1486_v30 = vsub.s32 32, %v1485_v59  ;;  %v1490_v39 = vsub.s32 4294967266, %v1485_v59  ;;  %v1487_v0 = vshll.u32 %v1478_v48, %v1485_v59 }
 0x243   :  { %v1488_v3 = vshrl.u32 %v1470_v56, %v1486_v30  ;;  %v1491_v4 = vadd.s32 127, %v1490_v39 }
 0x244   :  { %v1643_v27 = vpop.eup %1642 }
 0x245   :  { %v1645_v45 = vpop.eup %1644  ;;  %v1410_v53 = vxor.u32 2147483648, %v1643_v27  ;;  %v1489_v62 = vor.u32 %v1488_v3, %v1487_v0  ;;  %v1492_v9 = vshll.u32 %v1491_v4, 23 }
 0x246   :  { %v1407_v35 = vxor.u32 2147483648, %v1645_v45 }
 0x247   :  { %v1411_v12 = vsel %vm1409_vm15, %v1410_v53, %v1645_v45  ;;  %v1493_v34 = vor.u32 4788187, %v1492_v9  ;;  %v1496_v14 = vcvt.s32.f32 %v1489_v62 }
 0x248   :  { %v1408_v22 = vsel %vm1406_vm0, %v1643_v27, %v1407_v35 }
 0x249   :  { %v1412_v49 = vsel %vm1405_vm1, %v1408_v22, %v1411_v12  ;;  %v1494_v20 = vand.u32 2147483647, %v1493_v34 }
 0x24a   :  { %v1413_v36 = vsel %vm1403_vm2, nan, %v1412_v49 }
 0x24b   :  { %1523 = vst [vmem:[#allocation2 + $0x30] sm:$0xff] %v1413_v36  ;;  %v1497_v16 = vmul.f32 %v1496_v14, %v1494_v20 }
 0x24d   :  { %v1498_v41 = vxor.u32 2147483648, %v1497_v16 }
 0x24f   :  { %v1499_v13 = vsel %vm1416_vm3, %v1498_v41, %v1497_v16 }
 0x250   :  { %v1502_v7 = vsel %vm1415_vm4, %v2297_v57, %v1499_v13 }
 0x251   :  { %1646 = vcosq.f32 %v1502_v7 }
 0x252   :  { %1648 = vsinq.f32 %v1502_v7 }
 0x25e   :  { %v1647_v58 = vpop.eup %1646 }
 0x25f   :  { %v1649_v28 = vpop.eup %1648  ;;  %v1513_v63 = vxor.u32 2147483648, %v1647_v58 }
 0x260   :  { %v1510_v1 = vxor.u32 2147483648, %v1649_v28 }
 0x261   :  { %v1514_v38 = vsel %vm1512_vm5, %v1513_v63, %v1649_v28 }
 0x262   :  { %v1511_v10 = vsel %vm1509_vm6, %v1647_v58, %v1510_v1 }
 0x263   :  { %v1515_v23 = vsel %vm1508_vm7, %v1511_v10, %v1514_v38 }
 0x264   :  { %v1516_v50 = vsel %vm1506_vm8, nan, %v1515_v23 }
 0x265   :  { %1524 = vst [vmem:[#allocation2 + $0x38] sm:$0xff] %v1516_v50 }
 0x266   :  { %1661 = shalt.err (!%p1658_p4)
}
 0x267   :  { %s1681_s10 = smov 256   ;;  %s1682_s11 = smov 16  }
 0x268   :  { %1536 = dma.vmem_to_hbm [thread:$0]  %s1531_s8, 1024, %s2412_s4, [#allocation3], %s1681_s10, %s1681_s10, %s1682_s11  }
 0x269   :  { %1670 = dma.done.wait [#allocation3], 1024  }
 0x26a   :  { %1671 = vsyncadd [#allocation3], 4294966272 }
 0x26b   :  { %1540 = vsyncpa [#allocation3], 1 }

</bundles_post_ra>
